<compile_context>
chip_gen: v6e
topology: v6e:2x2x1
jax: 0.10.0
libtpu: 0.0.40
codegen_flags: <defaults>
</compile_context>

<pallas_src>
import jax
import jax.numpy as jnp
from jax.experimental import pallas as pl
from jax.experimental.pallas import tpu as pltpu


# ----------------------------------------------------------------------------
# Fused kernel: [Linear+BN(folded)+ReLU] * L  ->  concat heads -> softmax/exp
# ----------------------------------------------------------------------------
def make_fused_kernel(num_layers, d_out):
    def kernel(*refs):
        z_ref = refs[0]
        layer_refs = refs[1:1 + 2 * num_layers]          # (w0, b0, w1, b1, ...)
        wh_ref = refs[1 + 2 * num_layers]                 # (H, 2D) bf16
        bh_ref = refs[2 + 2 * num_layers]                 # (1, 2D) f32
        lib_ref = refs[3 + 2 * num_layers]                # (TB, 1) f32
        norm_ref, disp_ref, imp_ref = refs[4 + 2 * num_layers:]

        x = z_ref[...]                                    # (TB, Z) f32
        for l in range(num_layers):
            w = layer_refs[2 * l][...]                    # bf16, BN folded in
            b = layer_refs[2 * l + 1][...]                # f32
            h = jnp.dot(x.astype(jnp.bfloat16), w,
                        preferred_element_type=jnp.float32) + b
            x = jnp.maximum(h, 0.0)                       # ReLU (Dropout = id)

        # Both heads in one wide MXU matmul, then slice (d_out multiple of 128
        # -> clean lane split, no layout copies).
        hb = jnp.dot(x.astype(jnp.bfloat16), wh_ref[...],
                     preferred_element_type=jnp.float32) + bh_ref[...]
        s = hb[:, :d_out]                                 # scale-head logits
        r = hb[:, d_out:]                                 # dispersion logits

        # softmax over features (dim=1), f32; divide -> EUP reciprocal.
        s = s - jnp.max(s, axis=1, keepdims=True)
        e = jnp.exp(s)
        inv_denom = pl.reciprocal(jnp.sum(e, axis=1, keepdims=True),
                                  approx=True)
        norm = e * inv_denom

        norm_ref[...] = norm
        imp_ref[...] = jnp.exp(lib_ref[...]) * norm       # library broadcast
        disp_ref[...] = jnp.exp(r)

    return kernel


# ----------------------------------------------------------------------------
# Param prep: fold eval-mode BatchNorm into the linear layers, concat heads.
# ----------------------------------------------------------------------------
def fold_params(params, eps=1e-3):                        # BN eps = 0.001
    folded = []
    for lp in params["decoder"]:
        scale = lp["gamma"] * jax.lax.rsqrt(lp["var"] + eps)      # (1, n_out)
        w = (lp["w"] * scale).astype(jnp.bfloat16)                # (n_in, n_out)
        b = ((lp["b"] - lp["mean"]) * scale + lp["beta"]).astype(jnp.float32)
        folded.append((w, b))
    wh = jnp.concatenate([params["ws"], params["wr"]], axis=1).astype(jnp.bfloat16)
    bh = jnp.concatenate([params["bs"], params["br"]], axis=1).astype(jnp.float32)
    return folded, wh, bh


# ----------------------------------------------------------------------------
# Wrapper: single pallas_call, grid over batch (parallel).
# ----------------------------------------------------------------------------
def decoder_nb_forward(z, library, params, *, batch_tile=128):
    layers, wh, bh = fold_params(params)
    num_layers = len(layers)
    B, Z = z.shape
    D = wh.shape[1] // 2
    assert B % batch_tile == 0 and batch_tile % 8 == 0
    assert D % 128 == 0, "keep the output feature dim lane-dense"

    inputs = [z]
    in_specs = [pl.BlockSpec((batch_tile, Z), lambda i: (i, 0))]
    for (w, b) in layers:
        inputs += [w, b]
        in_specs += [pl.BlockSpec(w.shape, lambda i: (0, 0)),
                     pl.BlockSpec(b.shape, lambda i: (0, 0))]
    inputs += [wh, bh, library]
    in_specs += [pl.BlockSpec(wh.shape, lambda i: (0, 0)),
                 pl.BlockSpec(bh.shape, lambda i: (0, 0)),
                 pl.BlockSpec((batch_tile, 1), lambda i: (i, 0))]

    out_shape = (jax.ShapeDtypeStruct((B, D), jnp.float32),   # normalized
                 jax.ShapeDtypeStruct((B, D), jnp.float32),   # disperation
                 jax.ShapeDtypeStruct((B, D), jnp.float32))   # imputation
    out_specs = (pl.BlockSpec((batch_tile, D), lambda i: (i, 0)),
                 pl.BlockSpec((batch_tile, D), lambda i: (i, 0)),
                 pl.BlockSpec((batch_tile, D), lambda i: (i, 0)))

    normalized, disper, imputation = pl.pallas_call(
        make_fused_kernel(num_layers, D),
        out_shape=out_shape,
        grid=(B // batch_tile,),
        in_specs=in_specs,
        out_specs=out_specs,
        compiler_params=pltpu.CompilerParams(
            dimension_semantics=("parallel",),      # batch rows independent
            vmem_limit_bytes=32 * 1024 * 1024,
        ),
    )(*inputs)
    return dict(normalized=normalized, disperation=disper,
                imputation=imputation)


# ----------------------------------------------------------------------------
# Pure-JAX reference (original un-folded f32 semantics) for correctness check.
# ----------------------------------------------------------------------------
def reference_forward(z, library, params, eps=1e-3):
    x = z
    for lp in params["decoder"]:
        h = x @ lp["w"] + lp["b"]
        h = (h - lp["mean"]) * jax.lax.rsqrt(lp["var"] + eps) * lp["gamma"] \
            + lp["beta"]
        x = jnp.maximum(h, 0.0)
    s = x @ params["ws"] + params["bs"]
    norm = jax.nn.softmax(s, axis=1)
    disp = jnp.exp(x @ params["wr"] + params["br"])
    imp = jnp.exp(library) * norm
    return dict(normalized=norm, disperation=disp, imputation=imp)


# ----------------------------------------------------------------------------
# Deterministic parameter init (synthetic; shapes follow Decoder_NB.__init__)
# ----------------------------------------------------------------------------
def init_params(key, layer, input_size):
    params = {"decoder": []}
    for n_in, n_out in zip(layer[:-1], layer[1:]):
        key, kw, kb, kg, kbe, km, kv = jax.random.split(key, 7)
        params["decoder"].append(dict(
            w=jax.random.normal(kw, (n_in, n_out), jnp.float32) * 0.1,
            b=jax.random.normal(kb, (1, n_out), jnp.float32) * 0.1,
            gamma=1.0 + 0.1 * jax.random.normal(kg, (1, n_out), jnp.float32),
            beta=0.1 * jax.random.normal(kbe, (1, n_out), jnp.float32),
            mean=0.1 * jax.random.normal(km, (1, n_out), jnp.float32),
            var=0.5 + jnp.abs(jax.random.normal(kv, (1, n_out), jnp.float32)),
        ))
    hidden = layer[-1]
    key, kws, kbs, kwr, kbr = jax.random.split(key, 5)
    params["ws"] = jax.random.normal(kws, (hidden, input_size), jnp.float32) * 0.1
    params["bs"] = jax.random.normal(kbs, (1, input_size), jnp.float32) * 0.1
    params["wr"] = jax.random.normal(kwr, (hidden, input_size), jnp.float32) * 0.1
    params["br"] = jax.random.normal(kbr, (1, input_size), jnp.float32) * 0.1
    return params


if __name__ == "__main__":
    key = jax.random.PRNGKey(0)

    B = 256                     # 2 batch tiles of 128 -> exercises the grid
    layer = [16, 128]           # [latent_dim, hidden]  (hidden lane-dense)
    input_size = 256            # gene count D (multiple of 128, lane-dense)

    k_z, k_lib, k_p = jax.random.split(key, 3)
    z = jax.random.normal(k_z, (B, layer[0]), jnp.float32)
    library = jax.random.normal(k_lib, (B, 1), jnp.float32)   # log-library size
    params = init_params(k_p, layer, input_size)

    out = decoder_nb_forward(z, library, params, batch_tile=128)
    out = jax.tree_util.tree_map(jax.block_until_ready, out)

    # shape / softmax sanity
    assert out["normalized"].shape == (B, input_size)
    assert out["disperation"].shape == (B, input_size)
    assert out["imputation"].shape == (B, input_size)
    assert jnp.allclose(jnp.sum(out["normalized"], axis=1), 1.0, atol=1e-2)

    # numerical check against un-folded f32 reference (bf16 weights + approx
    # reciprocal -> loose relative tolerance)
    ref = reference_forward(z, library, params)
    for name in ("normalized", "disperation", "imputation"):
        rel = jnp.max(jnp.abs(out[name] - ref[name]) /
                      (jnp.abs(ref[name]) + 1e-3))
        assert rel < 0.1, (name, float(rel))

    print("KERNEL_OK")
</pallas_src>

<mosaic_0001>
module attributes {stable_mosaic.version = 11 : i64} {
  func.func @kernel(%arg0: i32, %arg1: memref<128x16xf32, #tpu.memory_space<vmem>>, %arg2: memref<16x128xbf16, #tpu.memory_space<vmem>>, %arg3: memref<1x128xf32, #tpu.memory_space<vmem>>, %arg4: memref<128x512xbf16, #tpu.memory_space<vmem>>, %arg5: memref<1x512xf32, #tpu.memory_space<vmem>>, %arg6: memref<128x1xf32, #tpu.memory_space<vmem>>, %arg7: memref<128x256xf32, #tpu.memory_space<vmem>>, %arg8: memref<128x256xf32, #tpu.memory_space<vmem>>, %arg9: memref<128x256xf32, #tpu.memory_space<vmem>>) attributes {dimension_semantics = [#tpu.dimension_semantics<parallel>], iteration_bounds = array<i64: 2>, scalar_prefetch = 0 : i64, scratch_operands = 0 : i64, tpu.core_type = #tpu.core_type<tc>, window_params = [{transform_indices = @transform_0, window_bounds = array<i64: 128, 16>}, {pipeline_mode = #tpu.pipeline_mode<synchronous>, transform_indices = @transform_1, window_bounds = array<i64: 16, 128>}, {pipeline_mode = #tpu.pipeline_mode<synchronous>, transform_indices = @transform_2, window_bounds = array<i64: 1, 128>}, {pipeline_mode = #tpu.pipeline_mode<synchronous>, transform_indices = @transform_3, window_bounds = array<i64: 128, 512>}, {pipeline_mode = #tpu.pipeline_mode<synchronous>, transform_indices = @transform_4, window_bounds = array<i64: 1, 512>}, {transform_indices = @transform_5, window_bounds = array<i64: 128, 1>}, {transform_indices = @transform_6, window_bounds = array<i64: 128, 256>}, {transform_indices = @transform_7, window_bounds = array<i64: 128, 256>}, {transform_indices = @transform_8, window_bounds = array<i64: 128, 256>}]} {
    %c0 = arith.constant 0 : index
    %c0_0 = arith.constant 0 : index
    %0 = vector.load %arg1[%c0, %c0_0] : memref<128x16xf32, #tpu.memory_space<vmem>>, vector<128x16xf32>
    %c0_1 = arith.constant 0 : index
    %c0_2 = arith.constant 0 : index
    %1 = vector.load %arg2[%c0_1, %c0_2] : memref<16x128xbf16, #tpu.memory_space<vmem>>, vector<16x128xbf16>
    %c0_3 = arith.constant 0 : index
    %c0_4 = arith.constant 0 : index
    %2 = vector.load %arg3[%c0_3, %c0_4] : memref<1x128xf32, #tpu.memory_space<vmem>>, vector<1x128xf32>
    %3 = arith.truncf %0 : vector<128x16xf32> to vector<128x16xbf16>
    %cst = arith.constant dense<0.000000e+00> : vector<128x128xf32>
    %4 = tpu.matmul %3, %1, %cst {dimension_numbers = #tpu.dot_dimension_numbers<[1], [0], [0], [1], [0, 0, 1, 1], [], []>} : vector<128x16xbf16>, vector<16x128xbf16>, vector<128x128xf32> -> vector<128x128xf32>
    %5 = vector.broadcast %2 : vector<1x128xf32> to vector<128x128xf32>
    %6 = arith.addf %4, %5 : vector<128x128xf32>
    %cst_5 = arith.constant 0.000000e+00 : f32
    %7 = vector.broadcast %cst_5 : f32 to vector<128x128xf32>
    %8 = arith.maximumf %6, %7 : vector<128x128xf32>
    %9 = arith.truncf %8 : vector<128x128xf32> to vector<128x128xbf16>
    %c0_6 = arith.constant 0 : index
    %c0_7 = arith.constant 0 : index
    %10 = vector.load %arg4[%c0_6, %c0_7] : memref<128x512xbf16, #tpu.memory_space<vmem>>, vector<128x512xbf16>
    %cst_8 = arith.constant dense<0.000000e+00> : vector<128x512xf32>
    %11 = tpu.matmul %9, %10, %cst_8 {dimension_numbers = #tpu.dot_dimension_numbers<[1], [0], [0], [1], [0, 0, 1, 1], [], []>} : vector<128x128xbf16>, vector<128x512xbf16>, vector<128x512xf32> -> vector<128x512xf32>
    %c0_9 = arith.constant 0 : index
    %c0_10 = arith.constant 0 : index
    %12 = vector.load %arg5[%c0_9, %c0_10] : memref<1x512xf32, #tpu.memory_space<vmem>>, vector<1x512xf32>
    %13 = vector.broadcast %12 : vector<1x512xf32> to vector<128x512xf32>
    %14 = arith.addf %11, %13 : vector<128x512xf32>
    %15 = vector.extract_strided_slice %14 {offsets = [0, 0], sizes = [128, 256], strides = [1, 1]} : vector<128x512xf32> to vector<128x256xf32>
    %16 = vector.extract_strided_slice %14 {offsets = [0, 256], sizes = [128, 256], strides = [1, 1]} : vector<128x512xf32> to vector<128x256xf32>
    %cst_11 = arith.constant dense<0xFF800000> : vector<128xf32>
    %17 = vector.multi_reduction <maximumf>, %15, %cst_11 [1] : vector<128x256xf32> to vector<128xf32>
    %18 = vector.shape_cast %17 : vector<128xf32> to vector<128x1xf32>
    %19 = vector.broadcast %18 : vector<128x1xf32> to vector<128x256xf32>
    %20 = arith.subf %15, %19 : vector<128x256xf32>
    %21 = math.exp %20 : vector<128x256xf32>
    %cst_12 = arith.constant dense<0.000000e+00> : vector<128xf32>
    %22 = vector.multi_reduction <add>, %21, %cst_12 [1] : vector<128x256xf32> to vector<128xf32>
    %23 = vector.shape_cast %22 : vector<128xf32> to vector<128x1xf32>
    %24 = tpu.reciprocal %23 {approx = true} : vector<128x1xf32> -> vector<128x1xf32>
    %25 = vector.broadcast %24 : vector<128x1xf32> to vector<128x256xf32>
    %26 = arith.mulf %21, %25 : vector<128x256xf32>
    %c0_13 = arith.constant 0 : index
    %c0_14 = arith.constant 0 : index
    %27 = vector.load %arg7[%c0_13, %c0_14] : memref<128x256xf32, #tpu.memory_space<vmem>>, vector<128x256xf32>
    tpu.vector_store %arg7[%c0_13, %c0_14], %26 {strides = array<i32>} : memref<128x256xf32, #tpu.memory_space<vmem>>, vector<128x256xf32>,
    %c0_15 = arith.constant 0 : index
    %c0_16 = arith.constant 0 : index
    %28 = vector.load %arg6[%c0_15, %c0_16] : memref<128x1xf32, #tpu.memory_space<vmem>>, vector<128x1xf32>
    %29 = math.exp %28 : vector<128x1xf32>
    %30 = vector.broadcast %29 : vector<128x1xf32> to vector<128x256xf32>
    %31 = arith.mulf %30, %26 : vector<128x256xf32>
    %c0_17 = arith.constant 0 : index
    %c0_18 = arith.constant 0 : index
    %32 = vector.load %arg9[%c0_17, %c0_18] : memref<128x256xf32, #tpu.memory_space<vmem>>, vector<128x256xf32>
    tpu.vector_store %arg9[%c0_17, %c0_18], %31 {strides = array<i32>} : memref<128x256xf32, #tpu.memory_space<vmem>>, vector<128x256xf32>,
    %33 = math.exp %16 : vector<128x256xf32>
    %c0_19 = arith.constant 0 : index
    %c0_20 = arith.constant 0 : index
    %34 = vector.load %arg8[%c0_19, %c0_20] : memref<128x256xf32, #tpu.memory_space<vmem>>, vector<128x256xf32>
    tpu.vector_store %arg8[%c0_19, %c0_20], %33 {strides = array<i32>} : memref<128x256xf32, #tpu.memory_space<vmem>>, vector<128x256xf32>,
    return
  }
  func.func @transform_0(%arg0: i32) -> (i32, i32) {
    %c0_i32 = arith.constant 0 : i32
    %c0_i32_0 = arith.constant 0 : i32
    return %arg0, %c0_i32 : i32, i32
  }
  func.func @transform_1(%arg0: i32) -> (i32, i32) {
    %c0_i32 = arith.constant 0 : i32
    %c0_i32_0 = arith.constant 0 : i32
    %c0_i32_1 = arith.constant 0 : i32
    return %c0_i32, %c0_i32_0 : i32, i32
  }
  func.func @transform_2(%arg0: i32) -> (i32, i32) {
    %c0_i32 = arith.constant 0 : i32
    %c0_i32_0 = arith.constant 0 : i32
    %c0_i32_1 = arith.constant 0 : i32
    return %c0_i32, %c0_i32_0 : i32, i32
  }
  func.func @transform_3(%arg0: i32) -> (i32, i32) {
    %c0_i32 = arith.constant 0 : i32
    %c0_i32_0 = arith.constant 0 : i32
    %c0_i32_1 = arith.constant 0 : i32
    return %c0_i32, %c0_i32_0 : i32, i32
  }
  func.func @transform_4(%arg0: i32) -> (i32, i32) {
    %c0_i32 = arith.constant 0 : i32
    %c0_i32_0 = arith.constant 0 : i32
    %c0_i32_1 = arith.constant 0 : i32
    return %c0_i32, %c0_i32_0 : i32, i32
  }
  func.func @transform_5(%arg0: i32) -> (i32, i32) {
    %c0_i32 = arith.constant 0 : i32
    %c0_i32_0 = arith.constant 0 : i32
    return %arg0, %c0_i32 : i32, i32
  }
  func.func @transform_6(%arg0: i32) -> (i32, i32) {
    %c0_i32 = arith.constant 0 : i32
    %c0_i32_0 = arith.constant 0 : i32
    return %arg0, %c0_i32 : i32, i32
  }
  func.func @transform_7(%arg0: i32) -> (i32, i32) {
    %c0_i32 = arith.constant 0 : i32
    %c0_i32_0 = arith.constant 0 : i32
    return %arg0, %c0_i32 : i32, i32
  }
  func.func @transform_8(%arg0: i32) -> (i32, i32) {
    %c0_i32 = arith.constant 0 : i32
    %c0_i32_0 = arith.constant 0 : i32
    return %arg0, %c0_i32 : i32, i32
  }
}

</mosaic_0001>

<bundles_post_ra>
// kernel: tpu_custom_call.1
= control target key start
LH: loop header
LB: loop body
LE: loop exit
PB: predicated region body
PF: predicated region fallthrough
CT: control target
= control target key end

     0   :  { %s3161_s0 = inlined_call_operand.vmem [shape: f32[256,16], index: 0, kind: input, shape index: {}]   ;;  %s3162_s1 = inlined_call_operand.vmem [shape: bf16[16,128], index: 1, kind: input, shape index: {}]   ;;  %s3163_s2 = inlined_call_operand.vmem [shape: f32[1,128], index: 2, kind: input, shape index: {}]   ;;  %s3164_s3 = inlined_call_operand.vmem [shape: bf16[128,512], index: 3, kind: input, shape index: {}]   ;;  %s3165_s4 = inlined_call_operand.vmem [shape: f32[1,512], index: 4, kind: input, shape index: {}]   ;;  %s3166_s5 = inlined_call_operand.vmem [shape: f32[256,1], index: 5, kind: input, shape index: {}]   ;;  %s3167_s6 = inlined_call_operand.hbm [shape: f32[256,256], index: 6, kind: output, shape index: {0}]   ;;  %s3168_s7 = inlined_call_operand.hbm [shape: f32[256,256], index: 7, kind: output, shape index: {1}]   ;;  %s3169_s8 = inlined_call_operand.hbm [shape: f32[256,256], index: 8, kind: output, shape index: {2}]  }
   0x1   :  { %3176 = sst [smem:[#allocation9_spill]] %s3161_s0 }
   0x2   :  { %3177 = sst [smem:[#allocation10_spill]] %s3162_s1 }
   0x3   :  { %14 = vsyncpa [#allocation3], 0 }
   0x4   :  { %16 = vsyncpa [#allocation3 + $0x1], 0 }
   0x5   :  { %17 = vsyncpa [#allocation5], 0 }
   0x6   :  { %19 = vsyncpa [#allocation5 + $0x1], 0  ;;  %s2293_s27 = smov 0   ;;  %s2295_s28 = smov 0  }
   0x7   :  { %s2297_s29 = smov 0   ;;  %s2299_s30 = smov 0  }
   0x8 LB: > { %s2314_s9 = sadd.s32 4294967295, %s2240_s30   ;;  %s3170_s10 = sadd.s32 4294967294, %s2240_s30   ;;  %s2240_s30 = sphi %s2299_s30, %s3189_s30   ;;  %s2236_s29 = sphi %s2297_s29, %s3188_s29   ;;  %s2232_s28 = sphi %s2295_s28, %s3187_s28   ;;  %s2228_s27 = sphi %s2293_s27, %s3186_s27  }
   0x9   : > { %s2318_s11 = sadd.s32 1, %s2240_s30   ;;  %s168_s12 = sadd.s32 1, %s2236_s29 }
   0xa   : > { %s165_s13 = ssub.s32 %s2240_s30, %s2318_s11  ;;  %p178_p0 = scmp.ne.s32.totalorder %s2236_s29, %s2232_s28 }
   0xb   : > { %p166_p1 = scmp.eq.s32.totalorder %s165_s13, 0  ;;  %p179_p2 = scmp.eq.s32.totalorder %s2314_s9, 1 }
   0xc   : > { %p184_p3 = scmp.ne.s32.totalorder %s2232_s28, %s2228_s27  ;;  %p185_p4 = scmp.eq.s32.totalorder %s3170_s10, 1 }
   0xd   : > { %s2331_s14 = scalar_select %p166_p1, %s2236_s29, %s168_s12  }
   0xe   : > { %p2333_p5 = por %p179_p2, %p178_p0  ;;  %p2337_p6 = por %p185_p4, %p184_p3 }
   0xf   : > { %p1732_p7 = scmp.ge.s32.totalorder %s2240_s30, 1  ;;  %p285_p8 = scmp.lt.s32.totalorder %s2240_s30, 3 }
  0x11   : > { %p286_p9 = pnand %p1732_p7, %p285_p8 }
  0x12   : > { %s3180_s1 = sld [smem:[#allocation10_spill]] (!%p286_p9)  ;;  %s1736_s19 = sshll.u32 (!%p286_p9), %s2314_s9, 4 }
  0x13   : > { %289 = sbr.rel (%p286_p9) target bundleno = 849 (0x351), region = 44  ;;  %p335_p10 = scmp.lt.s32.totalorder (!%p286_p9), %s1736_s19, 31 }
  0x14   : > { %s3181_s0 = sld [smem:[#allocation9_spill]] (!%p286_p9)  ;;  %s3171_s25 = sand.u32 (!%p286_p9), 1, %s2232_s28  }
  0x15   : > { %s2576_s26 = sshll.u32 (!%p286_p9), %s3171_s25, 8  ;;  %s1540_s17 = sand.u32 (!%p286_p9), 1, %s2314_s9  }
  0x16   : > { %s2592_s12 = scalar_lea.vmem (!%p286_p9), [#allocation4], %s2576_s26  ;;  %s2902_s18 = sshll.u32 (!%p286_p9), %s2314_s9, 12 }
  0x17   : > { %s2243_s9 = smov (!%p286_p9), [#allocation4]  }
  0x18   : > { %v1883_v0 = vld [vmem:[%s3180_s1] sm:$0xff]   ;;  %s3191_s19 = smov (!%p335_p10, %s1736_s19), 31  ;;  %v1888_v2 = vld [vmem:[%s3164_s3 + $0xec] ss:$16 sps:$4 sm:$0xff]   ;;  %v1886_v5 = vld [vmem:[%s3164_s3 + $0xe8] ss:$16 sps:$4 sm:$0xff]  }
  0x19   : > { %v1884_v1 = vld [vmem:[%s3164_s3 + $0xe4] ss:$16 sps:$4 sm:$0xff]   ;;  %1811 = vmatprep.subr.bf16.mxu0 %v1883_v0  ;;  %v1889_v3 = vld [vmem:[%s3164_s3 + $0xe0] ss:$16 sps:$4 sm:$0xff]   ;;  %s1737_s13 = sshll.u32 %s3191_s19, 3  ;;  %vm389_vm0 = vcmask 130048  }
  0x1a   : > { %1812 = vmatpush3.bf16.msra.mxu0 %v1883_v0  ;;  %749 = vmatprep.subr.bf16.mxu1 %v1884_v1  ;;  %v1890_v4 = vld [vmem:[%s3164_s3 + $0xc4] ss:$16 sps:$4 sm:$0xff]   ;;  %s2367_s20 = scalar_lea.vmem %s3181_s0, %s1737_s13  ;;  %v1895_v6 = vld [vmem:[%s3164_s3 + $0xc0] ss:$16 sps:$4 sm:$0xff]   ;;  %v1894_v16 = vld [vmem:[%s3164_s3 + $0xcc] ss:$16 sps:$4 sm:$0xff]   ;;  %s2486_s23 = scalar_lea.vmem %s3166_s5, %s1737_s13 }
  0x1b   : > { %862 = vmatprep.subr.bf16.mxu0 %v1888_v2  ;;  %750 = vmatpush1.bf16.msra.mxu1 %v1889_v3  ;;  %v350_v7 = vld [vmem:[%s2367_s20] sm:$0xff]  ;;  %v351_v8 = vld [vmem:[%s2367_s20 + $0x8] sm:$0xff]  ;;  %v352_v9 = vld [vmem:[%s2367_s20 + $0x10] sm:$0xff]  ;;  %v2242_v57 = vmov 0   ;;  %s1577_s19 = sshll.u32 %s2592_s12, 4  ;;  %s2913_s13 = scalar_lea.sflag [#allocation5], %s1540_s17  ;;  %s2911_s19 = int_to_ptr.vmem [resolvable:$true] %s1577_s19 }
  0x1c   : > { %751 = vmatprep.subr.bf16.mxu1 %v1890_v4  ;;  %v369_v10 = vpack.c.bf16 %v351_v8, %v350_v7  ;;  %v353_v11 = vld [vmem:[%s2367_s20 + $0x18] sm:$0xff]  ;;  %v354_v12 = vld [vmem:[%s2367_s20 + $0x20] sm:$0xff]  ;;  %v355_v13 = vld [vmem:[%s2367_s20 + $0x28] sm:$0xff]  ;;  %781 = vmatprep.mubr.bf16.mxu1 %v2242_v57  ;;  %s2124_s24 = scalar_lea.vmem %s2911_s19, 4096 }
  0x1d   : > { %v370_v14 = vpack.c.bf16 %v353_v11, %v352_v9  ;;  %v371_v15 = vpack.c.bf16 %v355_v13, %v354_v12  ;;  %v356_v17 = vld [vmem:[%s2367_s20 + $0x30] sm:$0xff]  ;;  %v357_v18 = vld [vmem:[%s2367_s20 + $0x38] sm:$0xff]  ;;  %v358_v20 = vld [vmem:[%s2367_s20 + $0x40] sm:$0xff]  ;;  %1882 = vset.pattern.permute.xlu1 %v2242_v57  ;;  %1881 = vset.pattern.permute.xlu0 %v2242_v57  ;;  %p2125_p11 = scmp.ne.s32.totalorder %s2911_s19, %s2124_s24 }
  0x1e   : > { %1813 = vmatprep.mubr.msk.bf16.mxu0 %vm389_vm0, %v369_v10  ;;  %v1892_v19 = vld [vmem:[%s3164_s3 + $0xc8] ss:$16 sps:$4 sm:$0xff]   ;;  %v1896_v21 = vld [vmem:[%s3164_s3 + $0xa4] ss:$16 sps:$4 sm:$0xff]   ;;  %v1900_v23 = vld [vmem:[%s3164_s3 + $0xac] ss:$16 sps:$4 sm:$0xff]   ;;  %v372_v25 = vpack.c.bf16 %v357_v18, %v356_v17 }
  0x1f   : > { %752 = vmatpush1.bf16.msra.mxu1 %v1895_v6  ;;  %1814 = vmatmul.mubr.msk.bf16.vlgmr.msra.gmra.mxu0 %vm389_vm0, %v370_v14  ;;  %v359_v22 = vld [vmem:[%s2367_s20 + $0x48] sm:$0xff]  ;;  %v1901_v24 = vld [vmem:[%s3164_s3 + $0xa0] ss:$16 sps:$4 sm:$0xff]   ;;  %v1902_v26 = vld [vmem:[%s3164_s3 + $0x84] ss:$16 sps:$4 sm:$0xff]   ;;  %p2126_p12 = pnand %p2125_p11, %p2333_p5 }
  0x20   : > { %1817 = vmatprep.mubr.msk.bf16.mxu0 %vm389_vm0, %v371_v15  ;;  %863 = vmatpush1.bf16.msra.mxu0 %v1886_v5  ;;  %v373_v27 = vpack.c.bf16 %v359_v22, %v358_v20  ;;  %v1898_v28 = vld [vmem:[%s3164_s3 + $0xa8] ss:$16 sps:$4 sm:$0xff]   ;;  %v1906_v29 = vld [vmem:[%s3164_s3 + $0x8c] ss:$16 sps:$4 sm:$0xff]   ;;  %v1907_v30 = vld [vmem:[%s3164_s3 + $0x80] ss:$16 sps:$4 sm:$0xff]  }
  0x21   : > { %864 = vmatprep.subr.bf16.mxu0 %v1894_v16  ;;  %753 = vmatprep.subr.bf16.mxu1 %v1896_v21  ;;  %v360_v31 = vld [vmem:[%s2367_s20 + $0x50] sm:$0xff]  ;;  %v361_v32 = vld [vmem:[%s2367_s20 + $0x58] sm:$0xff]  ;;  %v362_v35 = vld [vmem:[%s2367_s20 + $0x60] sm:$0xff]  ;;  %p2127_p13 = pneg %p2126_p12 }
  0x22   : > { %v1904_v33 = vld [vmem:[%s3164_s3 + $0x88] ss:$16 sps:$4 sm:$0xff]   ;;  %v1908_v34 = vld [vmem:[%s3164_s3 + $0x64] ss:$16 sps:$4 sm:$0xff]   ;;  %v1912_v37 = vld [vmem:[%s3164_s3 + $0x6c] ss:$16 sps:$4 sm:$0xff]   ;;  %v374_v39 = vpack.c.bf16 %v361_v32, %v360_v31 }
  0x23   : > { %754 = vmatpush1.bf16.msra.mxu1 %v1901_v24  ;;  %v363_v36 = vld [vmem:[%s2367_s20 + $0x68] sm:$0xff]  ;;  %v1913_v38 = vld [vmem:[%s3164_s3 + $0x60] ss:$16 sps:$4 sm:$0xff]   ;;  %v365_v43 = vld [vmem:[%s2367_s20 + $0x78] sm:$0xff] }
  0x24   : > { %865 = vmatpush1.bf16.msra.mxu0 %v1892_v19  ;;  %755 = vmatprep.subr.bf16.mxu1 %v1902_v26  ;;  %v375_v40 = vpack.c.bf16 %v363_v36, %v362_v35  ;;  %v1910_v41 = vld [vmem:[%s3164_s3 + $0x68] ss:$16 sps:$4 sm:$0xff]   ;;  %v364_v42 = vld [vmem:[%s2367_s20 + $0x70] sm:$0xff]  ;;  %v1918_v46 = vld [vmem:[%s3164_s3 + $0x4c] ss:$16 sps:$4 sm:$0xff]   ;;  %s2128_s20 = sshll.u32 %s2243_s9, 4  ;;  %s2129_s20 = int_to_ptr.vmem [resolvable:$false] %s2128_s20 }
  0x25   : > { %866 = vmatprep.subr.bf16.mxu0 %v1900_v23  ;;  %v376_v44 = vpack.c.bf16 %v365_v43, %v364_v42  ;;  %v1914_v45 = vld [vmem:[%s3164_s3 + $0x44] ss:$16 sps:$4 sm:$0xff]   ;;  %v1916_v47 = vld [vmem:[%s3164_s3 + $0x48] ss:$16 sps:$4 sm:$0xff]   ;;  %v1919_v48 = vld [vmem:[%s3164_s3 + $0x40] ss:$16 sps:$4 sm:$0xff]   ;;  %p2131_p0 = scmp.lt.s32.totalorder %s2911_s19, %s2129_s20 }
  0x26   : > { %v1920_v49 = vld [vmem:[%s3164_s3 + $0x24] ss:$16 sps:$4 sm:$0xff]   ;;  %v1924_v50 = vld [vmem:[%s3164_s3 + $0x2c] ss:$16 sps:$4 sm:$0xff]   ;;  %v1922_v51 = vld [vmem:[%s3164_s3 + $0x28] ss:$16 sps:$4 sm:$0xff]  }
  0x27   : > { %1818 = vmatmul.mubr.msk.bf16.gmra.mxu0 %vm389_vm0, %v372_v25  ;;  %756 = vmatpush1.bf16.msra.mxu1 %v1907_v30  ;;  %v1925_v52 = vld [vmem:[%s3164_s3 + $0x20] ss:$16 sps:$4 sm:$0xff]   ;;  %v1926_v53 = vld [vmem:[%s3164_s3 + $0x4] ss:$16 sps:$4 sm:$0xff]   ;;  %v1930_v54 = vld [vmem:[%s3164_s3 + $0xc] ss:$16 sps:$4 sm:$0xff]  }
  0x28   : > { %1821 = vmatprep.mubr.msk.bf16.mxu0 %vm389_vm0, %v373_v27  ;;  %867 = vmatpush1.bf16.msra.mxu0 %v1898_v28  ;;  %v1928_v55 = vld [vmem:[%s3164_s3 + $0x8] ss:$16 sps:$4 sm:$0xff]   ;;  %v1931_v56 = vld [vmem:[%s3164_s3] ss:$16 sps:$4 sm:$0xff]   ;;  %s2130_s10 = scalar_lea.vmem %s2129_s20, 8192 }
  0x29   : > { %868 = vmatprep.subr.bf16.mxu0 %v1906_v29  ;;  %757 = vmatprep.subr.bf16.mxu1 %v1908_v34  ;;  %v1248_v58 = vld [vmem:[%s2486_s23 + $0x8] sm:$0xff]  ;;  %v1249_v59 = vld [vmem:[%s2486_s23 + $0x10] sm:$0xff]  ;;  %v1250_v62 = vld [vmem:[%s2486_s23 + $0x18] sm:$0xff]  ;;  %p2132_p1 = scmp.lt.s32.totalorder %s2130_s10, %s2124_s24 }
  0x2a   : > { %v1265_v60 = vmul.f32 1.442695, %v1248_v58  ;;  %v1267_v61 = vmul.f32 1.442695, %v1249_v59  ;;  %v1269_v63 = vmul.f32 1.442695, %v1250_v62 }
  0x2b   : > { %758 = vmatpush1.bf16.msra.mxu1 %v1913_v38  ;;  %v1251_v0 = vld [vmem:[%s2486_s23 + $0x20] sm:$0xff]  ;;  %v1256_v2 = vld [vmem:[%s2486_s23 + $0x48] sm:$0xff]  ;;  %v1253_v8 = vld [vmem:[%s2486_s23 + $0x30] sm:$0xff]  ;;  %p2133_p2 = por %p2132_p1, %p2131_p0 }
  0x2c   : > { %869 = vmatpush1.bf16.msra.mxu0 %v1904_v33  ;;  %759 = vmatprep.subr.bf16.mxu1 %v1914_v45  ;;  %1932 = vpow2.f32 %v1265_v60  ;;  %v1247_v1 = vld [vmem:[%s2486_s23] sm:$0xff]  ;;  %v1271_v4 = vmul.f32 1.442695, %v1251_v0  ;;  %v1252_v5 = vld [vmem:[%s2486_s23 + $0x28] sm:$0xff]  ;;  %v1281_v6 = vmul.f32 1.442695, %v1256_v2 }
  0x2d   : > { %870 = vmatprep.subr.bf16.mxu0 %v1912_v37  ;;  %1934 = vpow2.f32 %v1267_v61  ;;  %v1263_v3 = vmul.f32 1.442695, %v1247_v1  ;;  %v1273_v7 = vmul.f32 1.442695, %v1252_v5  ;;  %v1275_v10 = vmul.f32 1.442695, %v1253_v8  ;;  %p2134_p3 = pnand %p2133_p2, %p2127_p13 }
  0x2e   : > { %1936 = vpow2.f32 %v1269_v63  ;;  %v1254_v12 = vld [vmem:[%s2486_s23 + $0x38] sm:$0xff]  ;;  %v1255_v15 = vld [vmem:[%s2486_s23 + $0x40] sm:$0xff]  ;;  %v1257_v19 = vld [vmem:[%s2486_s23 + $0x50] sm:$0xff] }
  0x2f   : > { %1822 = vmatmul.mubr.msk.bf16.gmra.mxu0 %vm389_vm0, %v374_v39  ;;  %760 = vmatpush1.bf16.msra.mxu1 %v1919_v48  ;;  %1938 = vpow2.f32 %v1263_v3  ;;  %v1277_v13 = vmul.f32 1.442695, %v1254_v12  ;;  %v1279_v17 = vmul.f32 1.442695, %v1255_v15  ;;  %v1283_v21 = vmul.f32 1.442695, %v1257_v19 }
  0x30   : > { %1825 = vmatprep.mubr.msk.bf16.mxu0 %vm389_vm0, %v375_v40  ;;  %871 = vmatpush1.bf16.msra.mxu0 %v1910_v41  ;;  %1940 = vpow2.f32 %v1271_v4  ;;  %v2502_v29 = vld [vmem:[%s3163_s2] ss:$0 sm:$0xff] }
  0x31   : > { %872 = vmatprep.subr.bf16.mxu0 %v1918_v46  ;;  %761 = vmatprep.subr.bf16.mxu1 %v1920_v49  ;;  %1942 = vpow2.f32 %v1281_v6 }
  0x32   : > { %1944 = vpow2.f32 %v1273_v7 }
  0x33   : > { %762 = vmatpush1.bf16.msra.mxu1 %v1925_v52  ;;  %1946 = vpow2.f32 %v1275_v10 }
  0x34   : > { %873 = vmatpush1.bf16.msra.mxu0 %v1916_v47  ;;  %763 = vmatprep.subr.bf16.mxu1 %v1926_v53  ;;  %1948 = vpow2.f32 %v1277_v13 }
  0x35   : > { %874 = vmatprep.subr.bf16.mxu0 %v1924_v50  ;;  %1950 = vpow2.f32 %v1279_v17 }
  0x36   : > { %1952 = vpow2.f32 %v1283_v21  ;;  %v569_v21 = vlaneseq }
  0x37   : > { %1826 = vmatmul.mubr.msk.bf16.gmra.mxu0 %vm389_vm0, %v376_v44  ;;  %764 = vmatpush1.bf16.msra.mxu1 %v1931_v56 }
  0x38   : > { %875 = vmatpush1.bf16.msra.mxu0 %v1922_v51  ;;  %894 = vmatprep.mubr.bf16.mxu0 %v2242_v57 }
  0x39   : > { %876 = vmatprep.subr.bf16.mxu0 %v1930_v54  ;;  %v1933_v9 = vpop.eup %1932 }
  0x3a   : > { %1302 = vperm.xlu1 %1882, %v1933_v9   ;;  %v1935_v11 = vpop.eup %1934 }
  0x3b   : > { %v1937_v14 = vpop.eup %1936 }
  0x3c   : > { %877 = vmatpush1.bf16.msra.mxu0 %v1928_v55  ;;  %v1939_v16 = vpop.eup %1938 }
  0x3d   : > { %v1941_v18 = vpop.eup %1940  ;;  %1297 = vperm.xlu0 %1881, %v1939_v16  }
  0x3e   : > { %1307 = vperm.xlu1 %1882, %v1935_v11   ;;  %v1943_v20 = vpop.eup %1942 }
  0x3f   : > { %v1945_v22 = vpop.eup %1944 }
  0x40   : > { %v1947_v23 = vpop.eup %1946 }
  0x41   : > { %1342 = vperm.xlu0 %1881, %v1943_v20   ;;  %v1949_v24 = vpop.eup %1948 }
  0x42   : > { %1312 = vperm.xlu1 %1882, %v1937_v14   ;;  %v1951_v25 = vpop.eup %1950 }
  0x43   : > { %v1953_v26 = vpop.eup %1952 }
  0x46   : > { %1317 = vperm.xlu1 %1882, %v1941_v18  }
  0x4a   : > { %1322 = vperm.xlu1 %1882, %v1945_v22   ;;  %v570_v22 = vshrl.u32 %v569_v21, 7 }
  0x4e   : > { %1327 = vperm.xlu1 %1882, %v1947_v23   ;;  %v579_v23 = vsub.s32 2, %v570_v22 }
  0x52   : > { %1332 = vperm.xlu1 %1882, %v1949_v24   ;;  %v567_v24 = vld [vmem:[%s3165_s4] sm:$0xf] }
  0x56   : > { %1337 = vperm.xlu1 %1882, %v1951_v25   ;;  %v575_v25 = vsub.s32 1, %v570_v22 }
  0x5a   : > { %1347 = vperm.xlu1 %1882, %v1953_v26   ;;  %v583_v26 = vsub.s32 3, %v570_v22 }
  0xdf   : > { %v1815_v27 = vpop.f32.mrf.mxu0 }
  0xe0   : > { %v457_v41 = vadd.f32 %v1815_v27, %v2502_v29  ;;  %v571_v27 = vsub.s32 0, %v570_v22 }
  0xe1   : > { %v448_v28 = vpop.f32.mrf.mxu0 }
  0xe2   : > { %v449_v31 = vadd.f32 %v2502_v29, %v448_v28  ;;  %v513_v44 = vmax.f32 %v457_v41, 0.0  ;;  %v2537_v28 = vrot.slane %v567_v24, %v579_v23 }
  0xe3   : > { %v1816_v30 = vpop.f32.mrf.mxu0 }
  0xe4   : > { %v511_v35 = vmax.f32 %v449_v31, 0.0  ;;  %v460_v38 = vadd.f32 %v1816_v30, %v2502_v29  ;;  %v2543_v30 = vrot.slane %v567_v24, %v571_v27 }
  0xe5   : > { %v451_v32 = vpop.f32.mrf.mxu0 }
  0xe6   : > { %v452_v33 = vadd.f32 %v2502_v29, %v451_v32  ;;  %v514_v42 = vmax.f32 %v460_v38, 0.0 }
  0xe7   : > { %v1819_v34 = vpop.f32.mrf.mxu0 }
  0xe8   : > { %v512_v36 = vmax.f32 %v452_v33, 0.0  ;;  %v528_v45 = vpack.c.bf16 %v514_v42, %v513_v44  ;;  %v473_v52 = vadd.f32 %v1819_v34, %v2502_v29 }
  0xe9   : > { %v464_v37 = vpop.f32.mrf.mxu0 }
  0xea   : > { %v527_v39 = vpack.c.bf16 %v512_v36, %v511_v35  ;;  %v465_v46 = vadd.f32 %v2502_v29, %v464_v37  ;;  %v517_v56 = vmax.f32 %v473_v52, 0.0 }
  0xeb   : > { %v1820_v40 = vpop.f32.mrf.mxu0 }
  0xec   : > { %782 = vmatmul.mubr.bf16.vlgmr.msra.gmra.mxu1 %v527_v39  ;;  %895 = vmatmul.mubr.bf16.vlgmr.msra.gmra.mxu0 %v527_v39  ;;  %v515_v49 = vmax.f32 %v465_v46, 0.0  ;;  %v476_v53 = vadd.f32 %v1820_v40, %v2502_v29 }
  0xed   : > { %791 = vmatprep.mubr.bf16.mxu1 %v2242_v57  ;;  %904 = vmatprep.mubr.bf16.mxu0 %v2242_v57  ;;  %v467_v43 = vpop.f32.mrf.mxu0 }
  0xee   : > { %v468_v47 = vadd.f32 %v2502_v29, %v467_v43  ;;  %v518_v58 = vmax.f32 %v476_v53, 0.0 }
  0xef   : > { %v1823_v48 = vpop.f32.mrf.mxu0 }
  0xf0   : > { %v516_v50 = vmax.f32 %v468_v47, 0.0  ;;  %v530_v60 = vpack.c.bf16 %v518_v58, %v517_v56  ;;  %v489_v3 = vadd.f32 %v1823_v48, %v2502_v29 }
  0xf1   : > { %v480_v51 = vpop.f32.mrf.mxu0 }
  0xf2   : > { %v529_v54 = vpack.c.bf16 %v516_v50, %v515_v49  ;;  %v481_v61 = vadd.f32 %v2502_v29, %v480_v51  ;;  %v521_v7 = vmax.f32 %v489_v3, 0.0 }
  0xf3   : > { %v1824_v55 = vpop.f32.mrf.mxu0 }
  0xf4   : > { %792 = vmatmul.mubr.bf16.gmra.mxu1 %v528_v45  ;;  %905 = vmatmul.mubr.bf16.gmra.mxu0 %v528_v45  ;;  %v519_v0 = vmax.f32 %v481_v61, 0.0  ;;  %v492_v4 = vadd.f32 %v1824_v55, %v2502_v29 }
  0xf5   : > { %801 = vmatprep.mubr.bf16.mxu1 %v2242_v57  ;;  %914 = vmatprep.mubr.bf16.mxu0 %v2242_v57  ;;  %v483_v59 = vpop.f32.mrf.mxu0 }
  0xf6   : > { %v484_v62 = vadd.f32 %v2502_v29, %v483_v59  ;;  %v522_v8 = vmax.f32 %v492_v4, 0.0 }
  0xf7   : > { %v1827_v63 = vpop.f32.mrf.mxu0 }
  0xf8   : > { %v520_v1 = vmax.f32 %v484_v62, 0.0  ;;  %v532_v10 = vpack.c.bf16 %v522_v8, %v521_v7  ;;  %v505_v15 = vadd.f32 %v1827_v63, %v2502_v29 }
  0xf9   : > { %v496_v2 = vpop.f32.mrf.mxu0 }
  0xfa   : > { %v531_v5 = vpack.c.bf16 %v520_v1, %v519_v0  ;;  %v497_v11 = vadd.f32 %v2502_v29, %v496_v2  ;;  %v525_v18 = vmax.f32 %v505_v15, 0.0 }
  0xfb   : > { %v1828_v6 = vpop.f32.mrf.mxu0 }
  0xfc   : > { %802 = vmatmul.mubr.bf16.gmra.mxu1 %v529_v54  ;;  %915 = vmatmul.mubr.bf16.gmra.mxu0 %v529_v54  ;;  %v523_v13 = vmax.f32 %v497_v11, 0.0  ;;  %v508_v16 = vadd.f32 %v1828_v6, %v2502_v29 }
  0xfd   : > { %811 = vmatprep.mubr.bf16.mxu1 %v2242_v57  ;;  %924 = vmatprep.mubr.bf16.mxu0 %v2242_v57  ;;  %v499_v9 = vpop.f32.mrf.mxu0 }
  0xfe   : > { %v500_v12 = vadd.f32 %v2502_v29, %v499_v9  ;;  %v526_v19 = vmax.f32 %v508_v16, 0.0  ;;  %v2539_v29 = vrot.slane %v567_v24, %v575_v25 }
 0x100   : > { %v524_v14 = vmax.f32 %v500_v12, 0.0  ;;  %v534_v20 = vpack.c.bf16 %v526_v19, %v525_v18 }
 0x102   : > { %v533_v17 = vpack.c.bf16 %v524_v14, %v523_v13 }
 0x104   : > { %812 = vmatmul.mubr.bf16.gmra.mxu1 %v530_v60  ;;  %925 = vmatmul.mubr.bf16.gmra.mxu0 %v530_v60 }
 0x105   : > { %821 = vmatprep.mubr.bf16.mxu1 %v2242_v57  ;;  %934 = vmatprep.mubr.bf16.mxu0 %v2242_v57 }
 0x10c   : > { %822 = vmatmul.mubr.bf16.gmra.mxu1 %v531_v5  ;;  %935 = vmatmul.mubr.bf16.gmra.mxu0 %v531_v5 }
 0x10d   : > { %831 = vmatprep.mubr.bf16.mxu1 %v2242_v57  ;;  %944 = vmatprep.mubr.bf16.mxu0 %v2242_v57 }
 0x114   : > { %832 = vmatmul.mubr.bf16.gmra.mxu1 %v532_v10  ;;  %945 = vmatmul.mubr.bf16.gmra.mxu0 %v532_v10 }
 0x115   : > { %841 = vmatprep.mubr.bf16.mxu1 %v2242_v57  ;;  %954 = vmatprep.mubr.bf16.mxu0 %v2242_v57 }
 0x11c   : > { %842 = vmatmul.mubr.bf16.gmra.mxu1 %v533_v17  ;;  %955 = vmatmul.mubr.bf16.gmra.mxu0 %v533_v17 }
 0x11d   : > { %851 = vmatprep.mubr.bf16.mxu1 %v2242_v57  ;;  %964 = vmatprep.mubr.bf16.mxu0 %v2242_v57  ;;  %v2541_v57 = vrot.slane %v567_v24, %v583_v26 }
 0x124   : > { %852 = vmatmul.mubr.bf16.gmra.mxu1 %v534_v20  ;;  %965 = vmatmul.mubr.bf16.gmra.mxu0 %v534_v20 }
 0x1ac   : > { %v783_v31 = vpop.f32.mrf.mxu1  ;;  %v896_v32 = vpop.f32.mrf.mxu0 }
 0x1ad   : > { %v897_v33 = vadd.f32 %v896_v32, %v2537_v28  ;;  %v2551_v39 = vadd.f32 %v783_v31, %v2543_v30 }
 0x1ae   : > { %v785_v34 = vpop.f32.mrf.mxu1  ;;  %v898_v35 = vpop.f32.mrf.mxu0 }
 0x1af   : > { %v1439_v36 = vmul.f32 1.442695, %v897_v33  ;;  %v2547_v37 = vadd.f32 %v785_v34, %v2539_v29  ;;  %v899_v38 = vadd.f32 %v898_v35, %v2541_v57 }
 0x1b0   : > { %v787_v40 = vpop.f32.mrf.mxu1  ;;  %v900_v41 = vpop.f32.mrf.mxu0 }
 0x1b1   : > { %1954 = vpow2.f32 %v1439_v36  ;;  %v1441_v42 = vmul.f32 1.442695, %v899_v38  ;;  %v901_v43 = vadd.f32 %v900_v41, %v2537_v28  ;;  %v975_v46 = vmax.f32 %v2551_v39, %v2547_v37 }
 0x1b2   : > { %v789_v44 = vpop.f32.mrf.mxu1  ;;  %v902_v45 = vpop.f32.mrf.mxu0  ;;  %v2561_v50 = vadd.f32 %v787_v40, %v2543_v30 }
 0x1b3   : > { %1956 = vpow2.f32 %v1441_v42  ;;  %v1443_v47 = vmul.f32 1.442695, %v901_v43  ;;  %v2557_v48 = vadd.f32 %v789_v44, %v2539_v29  ;;  %v903_v49 = vadd.f32 %v902_v45, %v2541_v57  ;;  %976 = vmax.xlane.f32.xlu0 %v975_v46 }
 0x1b4   : > { %v793_v51 = vpop.f32.mrf.mxu1  ;;  %v906_v52 = vpop.f32.mrf.mxu0 }
 0x1b5   : > { %1958 = vpow2.f32 %v1443_v47  ;;  %v1445_v53 = vmul.f32 1.442695, %v903_v49  ;;  %v907_v54 = vadd.f32 %v906_v52, %v2537_v28  ;;  %v978_v58 = vmax.f32 %v2561_v50, %v2557_v48 }
 0x1b6   : > { %v795_v55 = vpop.f32.mrf.mxu1  ;;  %v908_v56 = vpop.f32.mrf.mxu0  ;;  %v2572_v62 = vadd.f32 %v793_v51, %v2543_v30 }
 0x1b7   : > { %1960 = vpow2.f32 %v1445_v53  ;;  %v1447_v59 = vmul.f32 1.442695, %v907_v54  ;;  %v2568_v60 = vadd.f32 %v795_v55, %v2539_v29  ;;  %v909_v61 = vadd.f32 %v908_v56, %v2541_v57  ;;  %979 = vmax.xlane.f32.xlu0 %v978_v58 }
 0x1b8   : > { %v797_v63 = vpop.f32.mrf.mxu1  ;;  %v910_v0 = vpop.f32.mrf.mxu0 }
 0x1b9   : > { %1962 = vpow2.f32 %v1447_v59  ;;  %v1449_v1 = vmul.f32 1.442695, %v909_v61  ;;  %v911_v2 = vadd.f32 %v910_v0, %v2537_v28  ;;  %v981_v5 = vmax.f32 %v2572_v62, %v2568_v60 }
 0x1ba   : > { %v799_v3 = vpop.f32.mrf.mxu1  ;;  %v912_v4 = vpop.f32.mrf.mxu0  ;;  %v2586_v9 = vadd.f32 %v797_v63, %v2543_v30 }
 0x1bb   : > { %1964 = vpow2.f32 %v1449_v1  ;;  %v1451_v6 = vmul.f32 1.442695, %v911_v2  ;;  %v2582_v7 = vadd.f32 %v799_v3, %v2539_v29  ;;  %v913_v8 = vadd.f32 %v912_v4, %v2541_v57  ;;  %982 = vmax.xlane.f32.xlu1 %v981_v5 }
 0x1bc   : > { %v803_v10 = vpop.f32.mrf.mxu1  ;;  %v916_v11 = vpop.f32.mrf.mxu0 }
 0x1bd   : > { %1966 = vpow2.f32 %v1451_v6  ;;  %v1453_v12 = vmul.f32 1.442695, %v913_v8  ;;  %v917_v13 = vadd.f32 %v916_v11, %v2537_v28  ;;  %v984_v17 = vmax.f32 %v2586_v9, %v2582_v7 }
 0x1be   : > { %v1955_v14 = vpop.eup %1954  ;;  %v805_v15 = vpop.f32.mrf.mxu1  ;;  %v2600_v22 = vadd.f32 %v803_v10, %v2543_v30 }
 0x1bf   : > { %v918_v16 = vpop.f32.mrf.mxu0  ;;  %1503 = vst [vmem:[%s2592_s12] sm:$0xff] %v1955_v14  ;;  %1968 = vpow2.f32 %v1453_v12  ;;  %v1455_v18 = vmul.f32 1.442695, %v917_v13  ;;  %v2596_v19 = vadd.f32 %v805_v15, %v2539_v29  ;;  %985 = vmax.xlane.f32.xlu1 %v984_v17 }
 0x1c0   : > { %v919_v20 = vadd.f32 %v918_v16, %v2541_v57  ;;  %v1957_v21 = vpop.eup %1956  ;;  %v807_v23 = vpop.f32.mrf.mxu1 }
 0x1c1   : > { %v920_v24 = vpop.f32.mrf.mxu0  ;;  %1504 = vst [vmem:[%s2592_s12 + $0x8] sm:$0xff] %v1957_v21  ;;  %1970 = vpow2.f32 %v1455_v18  ;;  %v987_v33 = vmax.f32 %v2600_v22, %v2596_v19  ;;  %v2612_v40 = vadd.f32 %v807_v23, %v2543_v30 }
 0x1c2   : > { %v1457_v25 = vmul.f32 1.442695, %v919_v20  ;;  %v921_v26 = vadd.f32 %v920_v24, %v2537_v28  ;;  %v1959_v27 = vpop.eup %1958  ;;  %v809_v31 = vpop.f32.mrf.mxu1 }
 0x1c3   : > { %v922_v32 = vpop.f32.mrf.mxu0  ;;  %1505 = vst [vmem:[%s2592_s12 + $0x10] sm:$0xff] %v1959_v27  ;;  %v2608_v35 = vadd.f32 %v809_v31, %v2539_v29  ;;  %988 = vmax.xlane.f32.xlu0 %v987_v33 }
 0x1c4   : > { %1972 = vpow2.f32 %v1457_v25  ;;  %v1459_v34 = vmul.f32 1.442695, %v921_v26  ;;  %v923_v36 = vadd.f32 %v922_v32, %v2541_v57  ;;  %v1961_v38 = vpop.eup %1960  ;;  %v813_v41 = vpop.f32.mrf.mxu1 }
 0x1c5   : > { %v926_v42 = vpop.f32.mrf.mxu0  ;;  %1506 = vst [vmem:[%s2592_s12 + $0x18] sm:$0xff] %v1961_v38  ;;  %v990_v49 = vmax.f32 %v2612_v40, %v2608_v35  ;;  %v2624_v55 = vadd.f32 %v813_v41, %v2543_v30 }
 0x1c6   : > { %1974 = vpow2.f32 %v1459_v34  ;;  %v1461_v43 = vmul.f32 1.442695, %v923_v36  ;;  %v927_v44 = vadd.f32 %v926_v42, %v2537_v28  ;;  %v1963_v45 = vpop.eup %1962  ;;  %v815_v46 = vpop.f32.mrf.mxu1 }
 0x1c7   : > { %v928_v47 = vpop.f32.mrf.mxu0  ;;  %1507 = vst [vmem:[%s2592_s12 + $0x20] sm:$0xff] %v1963_v45  ;;  %v2620_v52 = vadd.f32 %v815_v46, %v2539_v29  ;;  %991 = vmax.xlane.f32.xlu1 %v990_v49 }
 0x1c8   : > { %1976 = vpow2.f32 %v1461_v43  ;;  %v1463_v51 = vmul.f32 1.442695, %v927_v44  ;;  %v929_v53 = vadd.f32 %v928_v47, %v2541_v57  ;;  %v1965_v54 = vpop.eup %1964  ;;  %v817_v56 = vpop.f32.mrf.mxu1 }
 0x1c9   : > { %v930_v58 = vpop.f32.mrf.mxu0  ;;  %1508 = vst [vmem:[%s2592_s12 + $0x28] sm:$0xff] %v1965_v54  ;;  %v993_v2 = vmax.f32 %v2624_v55, %v2620_v52  ;;  %v2636_v8 = vadd.f32 %v817_v56, %v2543_v30 }
 0x1ca   : > { %1978 = vpow2.f32 %v1463_v51  ;;  %v1465_v59 = vmul.f32 1.442695, %v929_v53  ;;  %v931_v61 = vadd.f32 %v930_v58, %v2537_v28  ;;  %v1967_v63 = vpop.eup %1966  ;;  %v819_v0 = vpop.f32.mrf.mxu1 }
 0x1cb   : > { %v932_v1 = vpop.f32.mrf.mxu0  ;;  %1509 = vst [vmem:[%s2592_s12 + $0x30] sm:$0xff] %v1967_v63  ;;  %v2632_v4 = vadd.f32 %v819_v0, %v2539_v29  ;;  %994 = vmax.xlane.f32.xlu0 %v993_v2 }
 0x1cc   : > { %1980 = vpow2.f32 %v1465_v59  ;;  %v1467_v3 = vmul.f32 1.442695, %v931_v61  ;;  %v933_v5 = vadd.f32 %v932_v1, %v2541_v57  ;;  %v1969_v6 = vpop.eup %1968  ;;  %v823_v10 = vpop.f32.mrf.mxu1 }
 0x1cd   : > { %v936_v11 = vpop.f32.mrf.mxu0  ;;  %1510 = vst [vmem:[%s2592_s12 + $0x38] sm:$0xff] %v1969_v6  ;;  %v996_v17 = vmax.f32 %v2636_v8, %v2632_v4  ;;  %v2648_v24 = vadd.f32 %v823_v10, %v2543_v30 }
 0x1ce   : > { %1982 = vpow2.f32 %v1467_v3  ;;  %v1469_v12 = vmul.f32 1.442695, %v933_v5  ;;  %v937_v13 = vadd.f32 %v936_v11, %v2537_v28  ;;  %v1971_v14 = vpop.eup %1970  ;;  %v825_v15 = vpop.f32.mrf.mxu1 }
 0x1cf   : > { %v938_v16 = vpop.f32.mrf.mxu0  ;;  %1511 = vst [vmem:[%s2592_s12 + $0x40] sm:$0xff] %v1971_v14  ;;  %v2644_v20 = vadd.f32 %v825_v15, %v2539_v29  ;;  %997 = vmax.xlane.f32.xlu1 %v996_v17 }
 0x1d0   : > { %1984 = vpow2.f32 %v1469_v12  ;;  %v1471_v18 = vmul.f32 1.442695, %v937_v13  ;;  %v939_v21 = vadd.f32 %v938_v16, %v2541_v57  ;;  %v827_v25 = vpop.f32.mrf.mxu1 }
 0x1d1   : > { %v1973_v23 = vpop.eup %1972  ;;  %v940_v26 = vpop.f32.mrf.mxu0  ;;  %v999_v36 = vmax.f32 %v2648_v24, %v2644_v20  ;;  %v2660_v44 = vadd.f32 %v827_v25, %v2543_v30 }
 0x1d2   : > { %1512 = vst [vmem:[%s2592_s12 + $0x48] sm:$0xff] %v1973_v23  ;;  %1986 = vpow2.f32 %v1471_v18  ;;  %v1473_v27 = vmul.f32 1.442695, %v939_v21  ;;  %v941_v31 = vadd.f32 %v940_v26, %v2537_v28  ;;  %v829_v33 = vpop.f32.mrf.mxu1 }
 0x1d3   : > { %v1975_v32 = vpop.eup %1974  ;;  %v942_v34 = vpop.f32.mrf.mxu0  ;;  %v2656_v41 = vadd.f32 %v829_v33, %v2539_v29  ;;  %1000 = vmax.xlane.f32.xlu0 %v999_v36 }
 0x1d4   : > { %1513 = vst [vmem:[%s2592_s12 + $0x50] sm:$0xff] %v1975_v32  ;;  %1988 = vpow2.f32 %v1473_v27  ;;  %v1475_v38 = vmul.f32 1.442695, %v941_v31  ;;  %v943_v42 = vadd.f32 %v942_v34, %v2541_v57  ;;  %v833_v45 = vpop.f32.mrf.mxu1 }
 0x1d5   : > { %v1977_v43 = vpop.eup %1976  ;;  %v946_v46 = vpop.f32.mrf.mxu0  ;;  %v1002_v56 = vmax.f32 %v2660_v44, %v2656_v41  ;;  %v2672_v0 = vadd.f32 %v833_v45, %v2543_v30 }
 0x1d6   : > { %1514 = vst [vmem:[%s2592_s12 + $0x58] sm:$0xff] %v1977_v43  ;;  %1990 = vpow2.f32 %v1475_v38  ;;  %v1477_v47 = vmul.f32 1.442695, %v943_v42  ;;  %v947_v49 = vadd.f32 %v946_v46, %v2537_v28  ;;  %v835_v53 = vpop.f32.mrf.mxu1 }
 0x1d7   : > { %v1979_v51 = vpop.eup %1978  ;;  %v948_v54 = vpop.f32.mrf.mxu0  ;;  %v2668_v59 = vadd.f32 %v835_v53, %v2539_v29  ;;  %1003 = vmax.xlane.f32.xlu1 %v1002_v56 }
 0x1d8   : > { %1515 = vst [vmem:[%s2592_s12 + $0x60] sm:$0xff] %v1979_v51  ;;  %1992 = vpow2.f32 %v1477_v47  ;;  %v1479_v58 = vmul.f32 1.442695, %v947_v49  ;;  %v949_v61 = vadd.f32 %v948_v54, %v2541_v57  ;;  %v837_v1 = vpop.f32.mrf.mxu1 }
 0x1d9   : > { %v1981_v63 = vpop.eup %1980  ;;  %v950_v2 = vpop.f32.mrf.mxu0  ;;  %v1005_v12 = vmax.f32 %v2672_v0, %v2668_v59  ;;  %v2684_v17 = vadd.f32 %v837_v1, %v2543_v30 }
 0x1da   : > { %1516 = vst [vmem:[%s2592_s12 + $0x68] sm:$0xff] %v1981_v63  ;;  %1994 = vpow2.f32 %v1479_v58  ;;  %v1481_v3 = vmul.f32 1.442695, %v949_v61  ;;  %v951_v5 = vadd.f32 %v950_v2, %v2537_v28  ;;  %v839_v10 = vpop.f32.mrf.mxu1 }
 0x1db   : > { %v1983_v6 = vpop.eup %1982  ;;  %v952_v11 = vpop.f32.mrf.mxu0  ;;  %v2680_v14 = vadd.f32 %v839_v10, %v2539_v29  ;;  %1006 = vmax.xlane.f32.xlu0 %v1005_v12 }
 0x1dc   : > { %1517 = vst [vmem:[%s2592_s12 + $0x70] sm:$0xff] %v1983_v6  ;;  %1996 = vpow2.f32 %v1481_v3  ;;  %v1483_v13 = vmul.f32 1.442695, %v951_v5  ;;  %v953_v15 = vadd.f32 %v952_v11, %v2541_v57  ;;  %v843_v18 = vpop.f32.mrf.mxu1 }
 0x1dd   : > { %v1985_v16 = vpop.eup %1984  ;;  %v956_v21 = vpop.f32.mrf.mxu0  ;;  %v1008_v32 = vmax.f32 %v2684_v17, %v2680_v14  ;;  %v2696_v42 = vadd.f32 %v843_v18, %v2543_v30 }
 0x1de   : > { %1518 = vst [vmem:[%s2592_s12 + $0x78] sm:$0xff] %v1985_v16  ;;  %1998 = vpow2.f32 %v1483_v13  ;;  %v1485_v23 = vmul.f32 1.442695, %v953_v15  ;;  %v957_v25 = vadd.f32 %v956_v21, %v2537_v28  ;;  %v845_v27 = vpop.f32.mrf.mxu1 }
 0x1df   : > { %v1987_v26 = vpop.eup %1986  ;;  %v958_v31 = vpop.f32.mrf.mxu0  ;;  %v2692_v34 = vadd.f32 %v845_v27, %v2539_v29  ;;  %1009 = vmax.xlane.f32.xlu1 %v1008_v32  ;;  %v1259_v32 = vld [vmem:[%s2486_s23 + $0x60] sm:$0xff] }
 0x1e0   : > { %1519 = vst [vmem:[%s2592_s12 + $0x80] sm:$0xff] %v1987_v26  ;;  %2000 = vpow2.f32 %v1485_v23  ;;  %v1487_v33 = vmul.f32 1.442695, %v957_v25  ;;  %v959_v36 = vadd.f32 %v958_v31, %v2541_v57  ;;  %v847_v43 = vpop.f32.mrf.mxu1 }
 0x1e1   : > { %v1989_v38 = vpop.eup %1988  ;;  %v960_v45 = vpop.f32.mrf.mxu0  ;;  %v1011_v54 = vmax.f32 %v2696_v42, %v2692_v34  ;;  %v2708_v1 = vadd.f32 %v847_v43, %v2543_v30 }
 0x1e2   : > { %1520 = vst [vmem:[%s2592_s12 + $0x88] sm:$0xff] %v1989_v38  ;;  %2002 = vpow2.f32 %v1487_v33  ;;  %v1489_v46 = vmul.f32 1.442695, %v959_v36  ;;  %v961_v47 = vadd.f32 %v960_v45, %v2537_v28  ;;  %v849_v51 = vpop.f32.mrf.mxu1 }
 0x1e3   : > { %v1991_v49 = vpop.eup %1990  ;;  %v962_v53 = vpop.f32.mrf.mxu0  ;;  %v2704_v58 = vadd.f32 %v849_v51, %v2539_v29  ;;  %1012 = vmax.xlane.f32.xlu0 %v1011_v54 }
 0x1e4   : > { %1521 = vst [vmem:[%s2592_s12 + $0x90] sm:$0xff] %v1991_v49  ;;  %2004 = vpow2.f32 %v1489_v46  ;;  %v1491_v56 = vmul.f32 1.442695, %v961_v47  ;;  %v963_v61 = vadd.f32 %v962_v53, %v2541_v57  ;;  %v853_v2 = vpop.f32.mrf.mxu1  ;;  %v1258_v49 = vld [vmem:[%s2486_s23 + $0x58] sm:$0xff] }
 0x1e5   : > { %v1993_v63 = vpop.eup %1992  ;;  %v966_v3 = vpop.f32.mrf.mxu0  ;;  %v1014_v13 = vmax.f32 %v2708_v1, %v2704_v58  ;;  %v2720_v23 = vadd.f32 %v853_v2, %v2543_v30 }
 0x1e6   : > { %1522 = vst [vmem:[%s2592_s12 + $0x98] sm:$0xff] %v1993_v63  ;;  %2006 = vpow2.f32 %v1491_v56  ;;  %v1493_v5 = vmul.f32 1.442695, %v963_v61  ;;  %v967_v6 = vadd.f32 %v966_v3, %v2537_v28  ;;  %v855_v11 = vpop.f32.mrf.mxu1  ;;  %v1285_v61 = vmul.f32 1.442695, %v1258_v49 }
 0x1e7   : > { %v1995_v10 = vpop.eup %1994  ;;  %v968_v12 = vpop.f32.mrf.mxu0  ;;  %v2716_v16 = vadd.f32 %v855_v11, %v2539_v29  ;;  %1015 = vmax.xlane.f32.xlu1 %v1014_v13 }
 0x1e8   : > { %1523 = vst [vmem:[%s2592_s12 + $0xa0] sm:$0xff] %v1995_v10  ;;  %2008 = vpow2.f32 %v1493_v5  ;;  %v1495_v15 = vmul.f32 1.442695, %v967_v6  ;;  %v969_v18 = vadd.f32 %v968_v12, %v2541_v57  ;;  %v857_v25 = vpop.f32.mrf.mxu1 }
 0x1e9   : > { %v1997_v21 = vpop.eup %1996  ;;  %v970_v26 = vpop.f32.mrf.mxu0  ;;  %v2726_v36 = vadd.f32 %v857_v25, %v2543_v30  ;;  %v1017_v45 = vmax.f32 %v2720_v23, %v2716_v16  ;;  %v1287_v30 = vmul.f32 1.442695, %v1259_v32 }
 0x1ea   : > { %1524 = vst [vmem:[%s2592_s12 + $0xa8] sm:$0xff] %v1997_v21  ;;  %2010 = vpow2.f32 %v1495_v15  ;;  %v1497_v27 = vmul.f32 1.442695, %v969_v18  ;;  %v971_v31 = vadd.f32 %v970_v26, %v2537_v28  ;;  %v859_v38 = vpop.f32.mrf.mxu1  ;;  %v2748_v18 = vpop.permute.xlu1 %1302 }
 0x1eb   : > { %v1999_v33 = vpop.eup %1998  ;;  %v972_v43 = vpop.f32.mrf.mxu0  ;;  %v2732_v47 = vadd.f32 %v859_v38, %v2539_v29  ;;  %1018 = vmax.xlane.f32.xlu0 %v1017_v45  ;;  %v1260_v29 = vld [vmem:[%s2486_s23 + $0x68] sm:$0xff] }
 0x1ec   : > { %1525 = vst [vmem:[%s2592_s12 + $0xb0] sm:$0xff] %v1999_v33  ;;  %2012 = vpow2.f32 %v1497_v27  ;;  %v1499_v46 = vmul.f32 1.442695, %v971_v31  ;;  %v973_v28 = vadd.f32 %v972_v43, %v2541_v57  ;;  %v1289_v2 = vmul.f32 1.442695, %v1260_v29  ;;  %v2760_v32 = vpop.permute.xlu0 %1297 }
 0x1ed   : > { %v2001_v51 = vpop.eup %2000  ;;  %v1020_v54 = vmax.f32 %v2726_v36, %v2732_v47 }
 0x1ee   : > { %1526 = vst [vmem:[%s2592_s12 + $0xb8] sm:$0xff] %v2001_v51  ;;  %2014 = vpow2.f32 %v1499_v46  ;;  %v1501_v53 = vmul.f32 1.442695, %v973_v28  ;;  %v2750_v21 = vpop.permute.xlu1 %1307 }
 0x1ef   : > { %v2003_v56 = vpop.eup %2002  ;;  %1021 = vmax.xlane.f32.xlu1 %v1020_v54 }
 0x1f0   : > { %1527 = vst [vmem:[%s2592_s12 + $0xc0] sm:$0xff] %v2003_v56  ;;  %2016 = vpow2.f32 %v1501_v53  ;;  %v2764_v38 = vpop.permute.xlu0 %1342 }
 0x1f1   : > { %v2005_v57 = vpop.eup %2004  ;;  %2018 = vpow2.f32 %v1287_v30 }
 0x1f2   : > { %1528 = vst [vmem:[%s2592_s12 + $0xc8] sm:$0xff] %v2005_v57  ;;  %2020 = vpow2.f32 %v1285_v61  ;;  %v2752_v25 = vpop.permute.xlu1 %1312 }
 0x1f3   : > { %v2007_v63 = vpop.eup %2006  ;;  %2022 = vpow2.f32 %v1289_v2 }
 0x1f4   : > { %1529 = vst [vmem:[%s2592_s12 + $0xd0] sm:$0xff] %v2007_v63 }
 0x1f5   : > { %v2009_v3 = vpop.eup %2008 }
 0x1f6   : > { %1530 = vst [vmem:[%s2592_s12 + $0xd8] sm:$0xff] %v2009_v3  ;;  %v2754_v26 = vpop.permute.xlu1 %1317 }
 0x1f7   : > { %v2011_v5 = vpop.eup %2010 }
 0x1f8   : > { %1531 = vst [vmem:[%s2592_s12 + $0xe0] sm:$0xff] %v2011_v5 }
 0x1f9   : > { %v2013_v6 = vpop.eup %2012 }
 0x1fa   : > { %1532 = vst [vmem:[%s2592_s12 + $0xe8] sm:$0xff] %v2013_v6  ;;  %v2756_v27 = vpop.permute.xlu1 %1322 }
 0x1fb   : > { %v2015_v10 = vpop.eup %2014 }
 0x1fc   : > { %1533 = vst [vmem:[%s2592_s12 + $0xf0] sm:$0xff] %v2015_v10 }
 0x1fd   : > { %v2017_v11 = vpop.eup %2016 }
 0x1fe   : > { %v2019_v12 = vpop.eup %2018  ;;  %1534 = vst [vmem:[%s2592_s12 + $0xf8] sm:$0xff] %v2017_v11  ;;  %v2758_v31 = vpop.permute.xlu1 %1327 }
 0x1ff   : > { %v2021_v13 = vpop.eup %2020 }
 0x200   : > { %1357 = vperm.xlu1 %1882, %v2019_v12   ;;  %v2023_v15 = vpop.eup %2022 }
 0x201   : > { %1352 = vperm.xlu0 %1881, %v2021_v13  }
 0x202   : > { %v2762_v33 = vpop.permute.xlu1 %1332 }
 0x205   : > { %1362 = vperm.xlu0 %1881, %v2023_v15  }
 0x206   : > { %v2766_v43 = vpop.permute.xlu1 %1337 }
 0x20a   : > { %v2770_v30 = vpop.permute.xlu1 %1347 }
 0x23c   : > { %v977_v45 = vpop.xlane.xlu0 %976 }
 0x23d   : > { %v1023_v46 = vsub.f32 %v2551_v39, %v977_v45  ;;  %v1024_v28 = vsub.f32 %v2547_v37, %v977_v45 }
 0x23f   : > { %v1055_v49 = vmul.f32 1.442695, %v1023_v46  ;;  %v1057_v51 = vmul.f32 1.442695, %v1024_v28 }
 0x240   : > { %v980_v53 = vpop.xlane.xlu0 %979 }
 0x241   : > { %2024 = vpow2.f32 %v1055_v49  ;;  %v1025_v54 = vsub.f32 %v2561_v50, %v980_v53  ;;  %v1026_v56 = vsub.f32 %v2557_v48, %v980_v53 }
 0x242   : > { %2026 = vpow2.f32 %v1057_v51 }
 0x243   : > { %v1059_v61 = vmul.f32 1.442695, %v1025_v54  ;;  %v1061_v29 = vmul.f32 1.442695, %v1026_v56 }
 0x244   : > { %v983_v57 = vpop.xlane.xlu1 %982 }
 0x245   : > { %2028 = vpow2.f32 %v1059_v61  ;;  %v1027_v63 = vsub.f32 %v2572_v62, %v983_v57  ;;  %v1028_v39 = vsub.f32 %v2568_v60, %v983_v57 }
 0x246   : > { %2030 = vpow2.f32 %v1061_v29 }
 0x247   : > { %v1063_v37 = vmul.f32 1.442695, %v1027_v63  ;;  %v1065_v2 = vmul.f32 1.442695, %v1028_v39 }
 0x248   : > { %v986_v3 = vpop.xlane.xlu1 %985 }
 0x249   : > { %2032 = vpow2.f32 %v1063_v37  ;;  %v1029_v5 = vsub.f32 %v2586_v9, %v986_v3  ;;  %v1030_v50 = vsub.f32 %v2582_v7, %v986_v3 }
 0x24a   : > { %2034 = vpow2.f32 %v1065_v2 }
 0x24b   : > { %v1067_v48 = vmul.f32 1.442695, %v1029_v5  ;;  %v1069_v6 = vmul.f32 1.442695, %v1030_v50 }
 0x24c   : > { %v989_v10 = vpop.xlane.xlu0 %988 }
 0x24d   : > { %2036 = vpow2.f32 %v1067_v48  ;;  %v1031_v11 = vsub.f32 %v2600_v22, %v989_v10  ;;  %v1032_v62 = vsub.f32 %v2596_v19, %v989_v10 }
 0x24e   : > { %v2780_v12 = vpop.eup %2024  ;;  %2038 = vpow2.f32 %v1069_v6 }
 0x24f   : > { %v2782_v60 = vpop.eup %2026  ;;  %v1071_v13 = vmul.f32 1.442695, %v1031_v11  ;;  %v1073_v15 = vmul.f32 1.442695, %v1032_v62 }
 0x250   : > { %v992_v45 = vpop.xlane.xlu1 %991  ;;  %v1119_v7 = vadd.f32 %v2782_v60, %v2780_v12 }
 0x251   : > { %2040 = vpow2.f32 %v1071_v13  ;;  %v1033_v9 = vsub.f32 %v2612_v40, %v992_v45  ;;  %v1034_v46 = vsub.f32 %v2608_v35, %v992_v45 }
 0x252   : > { %v2788_v28 = vpop.eup %2028  ;;  %2042 = vpow2.f32 %v1073_v15  ;;  %1120 = vadd.xlane.f32.xlu0 %v1119_v7 }
 0x253   : > { %v2790_v19 = vpop.eup %2030  ;;  %v1075_v22 = vmul.f32 1.442695, %v1033_v9  ;;  %v1077_v49 = vmul.f32 1.442695, %v1034_v46 }
 0x254   : > { %v995_v51 = vpop.xlane.xlu0 %994  ;;  %v1122_v53 = vadd.f32 %v2790_v19, %v2788_v28 }
 0x255   : > { %2044 = vpow2.f32 %v1075_v22  ;;  %v1035_v54 = vsub.f32 %v2624_v55, %v995_v51  ;;  %v1036_v56 = vsub.f32 %v2620_v52, %v995_v51 }
 0x256   : > { %v2796_v40 = vpop.eup %2032  ;;  %2046 = vpow2.f32 %v1077_v49  ;;  %1123 = vadd.xlane.f32.xlu1 %v1122_v53 }
 0x257   : > { %v2798_v35 = vpop.eup %2034  ;;  %v1079_v61 = vmul.f32 1.442695, %v1035_v54  ;;  %v1081_v29 = vmul.f32 1.442695, %v1036_v56 }
 0x258   : > { %v998_v57 = vpop.xlane.xlu1 %997  ;;  %v1125_v63 = vadd.f32 %v2798_v35, %v2796_v40 }
 0x259   : > { %2048 = vpow2.f32 %v1079_v61  ;;  %v1037_v39 = vsub.f32 %v2636_v8, %v998_v57  ;;  %v1038_v37 = vsub.f32 %v2632_v4, %v998_v57 }
 0x25a   : > { %v2804_v55 = vpop.eup %2036  ;;  %2050 = vpow2.f32 %v1081_v29  ;;  %1126 = vadd.xlane.f32.xlu0 %v1125_v63 }
 0x25b   : > { %v2806_v52 = vpop.eup %2038  ;;  %v1083_v2 = vmul.f32 1.442695, %v1037_v39  ;;  %v1085_v3 = vmul.f32 1.442695, %v1038_v37 }
 0x25c   : > { %v1001_v5 = vpop.xlane.xlu0 %1000  ;;  %v1128_v50 = vadd.f32 %v2806_v52, %v2804_v55 }
 0x25d   : > { %2052 = vpow2.f32 %v1083_v2  ;;  %v1039_v48 = vsub.f32 %v2648_v24, %v1001_v5  ;;  %v1040_v6 = vsub.f32 %v2644_v20, %v1001_v5 }
 0x25e   : > { %v2812_v8 = vpop.eup %2040  ;;  %2054 = vpow2.f32 %v1085_v3  ;;  %1129 = vadd.xlane.f32.xlu1 %v1128_v50 }
 0x25f   : > { %v2814_v4 = vpop.eup %2042  ;;  %v1087_v10 = vmul.f32 1.442695, %v1039_v48  ;;  %v1089_v11 = vmul.f32 1.442695, %v1040_v6 }
 0x260   : > { %v1004_v62 = vpop.xlane.xlu1 %1003  ;;  %v1131_v13 = vadd.f32 %v2814_v4, %v2812_v8 }
 0x261   : > { %2056 = vpow2.f32 %v1087_v10  ;;  %v1041_v15 = vsub.f32 %v2660_v44, %v1004_v62  ;;  %v1042_v45 = vsub.f32 %v2656_v41, %v1004_v62 }
 0x262   : > { %v2820_v24 = vpop.eup %2044  ;;  %2058 = vpow2.f32 %v1089_v11  ;;  %1132 = vadd.xlane.f32.xlu0 %v1131_v13 }
 0x263   : > { %v2822_v20 = vpop.eup %2046  ;;  %v1091_v7 = vmul.f32 1.442695, %v1041_v15  ;;  %v1093_v9 = vmul.f32 1.442695, %v1042_v45 }
 0x264   : > { %v1007_v46 = vpop.xlane.xlu0 %1006  ;;  %v1134_v22 = vadd.f32 %v2822_v20, %v2820_v24 }
 0x265   : > { %2060 = vpow2.f32 %v1091_v7  ;;  %v1043_v49 = vsub.f32 %v2672_v0, %v1007_v46  ;;  %v1044_v51 = vsub.f32 %v2668_v59, %v1007_v46 }
 0x266   : > { %v2828_v44 = vpop.eup %2048  ;;  %2062 = vpow2.f32 %v1093_v9  ;;  %1135 = vadd.xlane.f32.xlu1 %v1134_v22 }
 0x267   : > { %v2830_v41 = vpop.eup %2050  ;;  %v1095_v53 = vmul.f32 1.442695, %v1043_v49  ;;  %v1097_v54 = vmul.f32 1.442695, %v1044_v51 }
 0x268   : > { %v1010_v56 = vpop.xlane.xlu1 %1009  ;;  %v1137_v61 = vadd.f32 %v2830_v41, %v2828_v44 }
 0x269   : > { %2064 = vpow2.f32 %v1095_v53  ;;  %v1045_v29 = vsub.f32 %v2684_v17, %v1010_v56  ;;  %v1046_v57 = vsub.f32 %v2680_v14, %v1010_v56 }
 0x26a   : > { %v2836_v0 = vpop.eup %2052  ;;  %2066 = vpow2.f32 %v1097_v54  ;;  %1138 = vadd.xlane.f32.xlu0 %v1137_v61 }
 0x26b   : > { %v2838_v59 = vpop.eup %2054  ;;  %v1099_v63 = vmul.f32 1.442695, %v1045_v29  ;;  %v1101_v39 = vmul.f32 1.442695, %v1046_v57 }
 0x26c   : > { %v1013_v37 = vpop.xlane.xlu0 %1012  ;;  %v1140_v2 = vadd.f32 %v2838_v59, %v2836_v0 }
 0x26d   : > { %2068 = vpow2.f32 %v1099_v63  ;;  %v1047_v3 = vsub.f32 %v2696_v42, %v1013_v37  ;;  %v1048_v5 = vsub.f32 %v2692_v34, %v1013_v37 }
 0x26e   : > { %v2844_v17 = vpop.eup %2056  ;;  %2070 = vpow2.f32 %v1101_v39  ;;  %1141 = vadd.xlane.f32.xlu1 %v1140_v2 }
 0x26f   : > { %v2846_v14 = vpop.eup %2058  ;;  %v1103_v50 = vmul.f32 1.442695, %v1047_v3  ;;  %v1105_v48 = vmul.f32 1.442695, %v1048_v5 }
 0x270   : > { %v1016_v6 = vpop.xlane.xlu1 %1015  ;;  %v1143_v10 = vadd.f32 %v2846_v14, %v2844_v17 }
 0x271   : > { %2072 = vpow2.f32 %v1103_v50  ;;  %v1049_v11 = vsub.f32 %v2708_v1, %v1016_v6  ;;  %v1050_v62 = vsub.f32 %v2704_v58, %v1016_v6  ;;  %v1261_v50 = vld [vmem:[%s2486_s23 + $0x70] sm:$0xff] }
 0x272   : > { %v2852_v42 = vpop.eup %2060  ;;  %2074 = vpow2.f32 %v1105_v48  ;;  %1144 = vadd.xlane.f32.xlu0 %v1143_v10  ;;  %v1262_v10 = vld [vmem:[%s2486_s23 + $0x78] sm:$0xff]  ;;  %s2908_s23 = scalar_lea.hbm %s3168_s7, %s2902_s18 }
 0x273   : > { %v2854_v34 = vpop.eup %2062  ;;  %v1107_v13 = vmul.f32 1.442695, %v1049_v11  ;;  %v1109_v15 = vmul.f32 1.442695, %v1050_v62  ;;  %v1291_v62 = vmul.f32 1.442695, %v1261_v50 }
 0x274   : > { %v1019_v45 = vpop.xlane.xlu0 %1018  ;;  %v1146_v7 = vadd.f32 %v2854_v34, %v2852_v42 }
 0x275   : > { %2076 = vpow2.f32 %v1107_v13  ;;  %v1051_v9 = vsub.f32 %v2720_v23, %v1019_v45  ;;  %v1052_v46 = vsub.f32 %v2716_v16, %v1019_v45 }
 0x276   : > { %v2860_v1 = vpop.eup %2064  ;;  %2078 = vpow2.f32 %v1109_v15  ;;  %1147 = vadd.xlane.f32.xlu1 %v1146_v7  ;;  %v1293_v15 = vmul.f32 1.442695, %v1262_v10 }
 0x277   : > { %v2862_v58 = vpop.eup %2066  ;;  %v1111_v22 = vmul.f32 1.442695, %v1051_v9  ;;  %v1113_v49 = vmul.f32 1.442695, %v1052_v46 }
 0x278   : > { %v1022_v51 = vpop.xlane.xlu1 %1021  ;;  %v1149_v56 = vadd.f32 %v2862_v58, %v2860_v1 }
 0x279   : > { %v1053_v53 = vsub.f32 %v2726_v36, %v1022_v51  ;;  %v1054_v54 = vsub.f32 %v2732_v47, %v1022_v51  ;;  %2080 = vpow2.f32 %v1111_v22 }
 0x27a   : > { %v2868_v23 = vpop.eup %2068  ;;  %2082 = vpow2.f32 %v1113_v49  ;;  %1150 = vadd.xlane.f32.xlu0 %v1149_v56 }
 0x27b   : > { %v1115_v16 = vmul.f32 1.442695, %v1053_v53  ;;  %v1117_v61 = vmul.f32 1.442695, %v1054_v54  ;;  %v2870_v29 = vpop.eup %2070 }
 0x27c   : > { %v1152_v57 = vadd.f32 %v2870_v29, %v2868_v23 }
 0x27d   : > { %2084 = vpow2.f32 %v1115_v16 }
 0x27e   : > { %2086 = vpow2.f32 %v1117_v61  ;;  %v2874_v36 = vpop.eup %2072  ;;  %1153 = vadd.xlane.f32.xlu1 %v1152_v57 }
 0x27f   : > { %v2876_v47 = vpop.eup %2074  ;;  %2088 = vpow2.f32 %v1291_v62 }
 0x280   : > { %v1155_v63 = vadd.f32 %v2876_v47, %v2874_v36  ;;  %2090 = vpow2.f32 %v1293_v15 }
 0x282   : > { %v2880_v39 = vpop.eup %2076  ;;  %1156 = vadd.xlane.f32.xlu0 %v1155_v63 }
 0x283   : > { %v2882_v37 = vpop.eup %2078 }
 0x284   : > { %v1158_v2 = vadd.f32 %v2882_v37, %v2880_v39 }
 0x286   : > { %v2886_v3 = vpop.eup %2080  ;;  %1159 = vadd.xlane.f32.xlu1 %v1158_v2 }
 0x287   : > { %v2888_v5 = vpop.eup %2082 }
 0x288   : > { %v1161_v48 = vadd.f32 %v2888_v5, %v2886_v3 }
 0x28a   : > { %v2893_v6 = vpop.eup %2084  ;;  %1162 = vadd.xlane.f32.xlu0 %v1161_v48 }
 0x28b   : > { %v2896_v11 = vpop.eup %2086 }
 0x28c   : > { %v1164_v13 = vadd.f32 %v2896_v11, %v2893_v6  ;;  %v2089_v45 = vpop.eup %2088 }
 0x28d   : > { %v2091_v7 = vpop.eup %2090 }
 0x28e   : > { %1165 = vadd.xlane.f32.xlu1 %v1164_v13 }
 0x29f   : > { %1367 = vperm.xlu1 %1882, %v2089_v45  }
 0x2a0   : > { %1372 = vperm.xlu0 %1881, %v2091_v7  }
 0x2a1   : > { %2137 = shalt.err (!%p2134_p3)
}
 0x2a2   : > { %s2138_s12 = scalar_lea.hbm %s2908_s23, 4096  ;;  %s2142_s22 = scalar_lea.hbm %s3168_s7, 8192 }
 0x2a3   : > { %p2139_p4 = scmp.ne.s32.totalorder %s2908_s23, %s2138_s12  ;;  %p2143_p9 = scmp.lt.s32.totalorder %s2908_s23, %s3168_s7 }
 0x2a4   : > { %p2144_p10 = scmp.lt.s32.totalorder %s2142_s22, %s2138_s12 }
 0x2a5   : > { %p2140_p7 = pnand %p2139_p4, %p2333_p5 }
 0x2a6   : > { %p2145_p11 = por %p2144_p10, %p2143_p9 }
 0x2a7   : > { %p2141_p8 = pneg %p2140_p7 }
 0x2a9   : > { %p2146_p12 = pnand %p2145_p11, %p2141_p8 }
 0x2ab   : > { %2149 = shalt.err (!%p2146_p12)
}
 0x2ac   : > { %s3172_s10 = smov 256   ;;  %s3174_s24 = smov 16   ;;  %v2939_v9 = vpop.permute.xlu0 %1352  ;;  %v2943_v22 = vpop.permute.xlu1 %1357 }
 0x2ad   : > { %1830 = dma.vmem_to_hbm [thread:$0]  (%p2333_p5), %s2911_s19, 4096, %s2908_s23, %s2913_s13, %s3172_s10, %s3172_s10, %s3174_s24  }
 0x2ae   : > { %s2948_s25 = scalar_lea.vmem [#allocation2], %s2576_s26  ;;  %s2955_s23 = scalar_lea.vmem [#allocation6], %s2576_s26 }
 0x2af   : > { %s1560_s26 = sshll.u32 %s2948_s25, 4  ;;  %s1594_s19 = sshll.u32 %s2955_s23, 4  ;;  %s3077_s26 = int_to_ptr.vmem [resolvable:$true] %s1560_s26  ;;  %s3089_s19 = int_to_ptr.vmem [resolvable:$true] %s1594_s19 }
 0x2b0   : > { %v2941_v46 = vpop.permute.xlu0 %1362  ;;  %s3075_s17 = scalar_lea.hbm %s3167_s6, %s2902_s18  ;;  %s3087_s9 = scalar_lea.hbm %s3169_s8, %s2902_s18 }
 0x2b1   : > { %s3182_s20 = sand.u32 1, %s2232_s28   ;;  %s2150_s10 = scalar_lea.vmem %s3077_s26, 4096 }
 0x2b2   : > { %s1536_s12 = scalar_lea.sflag [#allocation3], %s3182_s20  ;;  %p2151_p13 = scmp.ne.s32.totalorder %s3077_s26, %s2150_s10 }
 0x2b3   : > { %s2246_s24 = smov [#allocation2]  }
 0x2b4   : > { %p2152_p0 = pnand %p2151_p13, %p2333_p5  ;;  %s2154_s0 = sshll.u32 %s2246_s24, 4  ;;  %s2155_s0 = int_to_ptr.vmem [resolvable:$false] %s2154_s0 }
 0x2b5   : > { %p2157_p2 = scmp.lt.s32.totalorder %s3077_s26, %s2155_s0 }
 0x2b6   : > { %p2153_p1 = pneg %p2152_p0 }
 0x2db   : > { %v1121_v49 = vpop.xlane.xlu0 %1120 }
 0x2dc   : > { %2092 = vrcp.f32 %v1121_v49 }
 0x2df   : > { %v1124_v51 = vpop.xlane.xlu1 %1123 }
 0x2e0   : > { %2094 = vrcp.f32 %v1124_v51 }
 0x2e3   : > { %v1127_v53 = vpop.xlane.xlu0 %1126 }
 0x2e4   : > { %2096 = vrcp.f32 %v1127_v53 }
 0x2e7   : > { %v1130_v54 = vpop.xlane.xlu1 %1129 }
 0x2e8   : > { %2098 = vrcp.f32 %v1130_v54 }
 0x2e9   : > { %v2093_v56 = vpop.eup %2092 }
 0x2ea   : > { %v1183_v16 = vmul.f32 %v2093_v56, %v2780_v12  ;;  %v1184_v61 = vmul.f32 %v2093_v56, %v2782_v60 }
 0x2eb   : > { %v1133_v57 = vpop.xlane.xlu0 %1132 }
 0x2ec   : > { %1215 = vst [vmem:[%s2948_s25] sm:$0xff] %v1183_v16  ;;  %1216 = vst [vmem:[%s2948_s25 + $0x8] sm:$0xff] %v1184_v61  ;;  %v1375_v63 = vmul.f32 %v2760_v32, %v1183_v16  ;;  %v1376_v2 = vmul.f32 %v2760_v32, %v1184_v61  ;;  %2100 = vrcp.f32 %v1133_v57 }
 0x2ed   : > { %v2095_v50 = vpop.eup %2094 }
 0x2ee   : > { %1407 = vst [vmem:[%s2955_s23] sm:$0xff] %v1375_v63  ;;  %1408 = vst [vmem:[%s2955_s23 + $0x8] sm:$0xff] %v1376_v2  ;;  %v1185_v12 = vmul.f32 %v2095_v50, %v2788_v28  ;;  %v1186_v60 = vmul.f32 %v2095_v50, %v2790_v19 }
 0x2ef   : > { %v1136_v48 = vpop.xlane.xlu1 %1135 }
 0x2f0   : > { %1217 = vst [vmem:[%s2948_s25 + $0x10] sm:$0xff] %v1185_v12  ;;  %1218 = vst [vmem:[%s2948_s25 + $0x18] sm:$0xff] %v1186_v60  ;;  %v1377_v32 = vmul.f32 %v2748_v18, %v1185_v12  ;;  %v1378_v10 = vmul.f32 %v2748_v18, %v1186_v60  ;;  %2102 = vrcp.f32 %v1136_v48 }
 0x2f1   : > { %v2097_v62 = vpop.eup %2096 }
 0x2f2   : > { %1409 = vst [vmem:[%s2955_s23 + $0x10] sm:$0xff] %v1377_v32  ;;  %1410 = vst [vmem:[%s2955_s23 + $0x18] sm:$0xff] %v1378_v10  ;;  %v1187_v13 = vmul.f32 %v2097_v62, %v2796_v40  ;;  %v1188_v28 = vmul.f32 %v2097_v62, %v2798_v35 }
 0x2f3   : > { %v1139_v19 = vpop.xlane.xlu0 %1138 }
 0x2f4   : > { %1219 = vst [vmem:[%s2948_s25 + $0x20] sm:$0xff] %v1187_v13  ;;  %1220 = vst [vmem:[%s2948_s25 + $0x28] sm:$0xff] %v1188_v28  ;;  %v1379_v15 = vmul.f32 %v2750_v21, %v1187_v13  ;;  %v1380_v45 = vmul.f32 %v2750_v21, %v1188_v28  ;;  %2104 = vrcp.f32 %v1139_v19 }
 0x2f5   : > { %v2099_v18 = vpop.eup %2098 }
 0x2f6   : > { %1411 = vst [vmem:[%s2955_s23 + $0x20] sm:$0xff] %v1379_v15  ;;  %1412 = vst [vmem:[%s2955_s23 + $0x28] sm:$0xff] %v1380_v45  ;;  %v1189_v7 = vmul.f32 %v2099_v18, %v2804_v55  ;;  %v1190_v40 = vmul.f32 %v2099_v18, %v2806_v52 }
 0x2f7   : > { %v1142_v35 = vpop.xlane.xlu1 %1141 }
 0x2f8   : > { %1221 = vst [vmem:[%s2948_s25 + $0x30] sm:$0xff] %v1189_v7  ;;  %1222 = vst [vmem:[%s2948_s25 + $0x38] sm:$0xff] %v1190_v40  ;;  %v1381_v49 = vmul.f32 %v2752_v25, %v1189_v7  ;;  %v1382_v51 = vmul.f32 %v2752_v25, %v1190_v40  ;;  %2106 = vrcp.f32 %v1142_v35 }
 0x2f9   : > { %v2101_v21 = vpop.eup %2100 }
 0x2fa   : > { %1413 = vst [vmem:[%s2955_s23 + $0x30] sm:$0xff] %v1381_v49  ;;  %1414 = vst [vmem:[%s2955_s23 + $0x38] sm:$0xff] %v1382_v51  ;;  %v1191_v53 = vmul.f32 %v2101_v21, %v2812_v8  ;;  %v1192_v55 = vmul.f32 %v2101_v21, %v2814_v4 }
 0x2fb   : > { %v1145_v52 = vpop.xlane.xlu0 %1144 }
 0x2fc   : > { %1223 = vst [vmem:[%s2948_s25 + $0x40] sm:$0xff] %v1191_v53  ;;  %1224 = vst [vmem:[%s2948_s25 + $0x48] sm:$0xff] %v1192_v55  ;;  %v1383_v54 = vmul.f32 %v2754_v26, %v1191_v53  ;;  %v1384_v56 = vmul.f32 %v2754_v26, %v1192_v55  ;;  %2108 = vrcp.f32 %v1145_v52 }
 0x2fd   : > { %v2103_v25 = vpop.eup %2102 }
 0x2fe   : > { %1415 = vst [vmem:[%s2955_s23 + $0x40] sm:$0xff] %v1383_v54  ;;  %1416 = vst [vmem:[%s2955_s23 + $0x48] sm:$0xff] %v1384_v56  ;;  %v1193_v16 = vmul.f32 %v2103_v25, %v2820_v24  ;;  %v1194_v8 = vmul.f32 %v2103_v25, %v2822_v20 }
 0x2ff   : > { %v1148_v4 = vpop.xlane.xlu1 %1147 }
 0x300   : > { %1225 = vst [vmem:[%s2948_s25 + $0x50] sm:$0xff] %v1193_v16  ;;  %1226 = vst [vmem:[%s2948_s25 + $0x58] sm:$0xff] %v1194_v8  ;;  %v1385_v61 = vmul.f32 %v2756_v27, %v1193_v16  ;;  %v1386_v57 = vmul.f32 %v2756_v27, %v1194_v8  ;;  %2110 = vrcp.f32 %v1148_v4 }
 0x301   : > { %v2105_v26 = vpop.eup %2104 }
 0x302   : > { %1417 = vst [vmem:[%s2955_s23 + $0x50] sm:$0xff] %v1385_v61  ;;  %1418 = vst [vmem:[%s2955_s23 + $0x58] sm:$0xff] %v1386_v57  ;;  %v1195_v63 = vmul.f32 %v2105_v26, %v2828_v44  ;;  %v1196_v24 = vmul.f32 %v2105_v26, %v2830_v41 }
 0x303   : > { %v1151_v20 = vpop.xlane.xlu0 %1150 }
 0x304   : > { %1227 = vst [vmem:[%s2948_s25 + $0x60] sm:$0xff] %v1195_v63  ;;  %1228 = vst [vmem:[%s2948_s25 + $0x68] sm:$0xff] %v1196_v24  ;;  %v1387_v2 = vmul.f32 %v2758_v31, %v1195_v63  ;;  %v1388_v50 = vmul.f32 %v2758_v31, %v1196_v24  ;;  %2112 = vrcp.f32 %v1151_v20 }
 0x305   : > { %v2107_v27 = vpop.eup %2106 }
 0x306   : > { %1419 = vst [vmem:[%s2955_s23 + $0x60] sm:$0xff] %v1387_v2  ;;  %1420 = vst [vmem:[%s2955_s23 + $0x68] sm:$0xff] %v1388_v50  ;;  %v1197_v12 = vmul.f32 %v2107_v27, %v2836_v0  ;;  %v1198_v44 = vmul.f32 %v2107_v27, %v2838_v59 }
 0x307   : > { %v1154_v41 = vpop.xlane.xlu1 %1153 }
 0x308   : > { %1229 = vst [vmem:[%s2948_s25 + $0x70] sm:$0xff] %v1197_v12  ;;  %1230 = vst [vmem:[%s2948_s25 + $0x78] sm:$0xff] %v1198_v44  ;;  %v1389_v60 = vmul.f32 %v2762_v33, %v1197_v12  ;;  %v1390_v48 = vmul.f32 %v2762_v33, %v1198_v44  ;;  %2114 = vrcp.f32 %v1154_v41 }
 0x309   : > { %v2109_v31 = vpop.eup %2108 }
 0x30a   : > { %1421 = vst [vmem:[%s2955_s23 + $0x70] sm:$0xff] %v1389_v60  ;;  %1422 = vst [vmem:[%s2955_s23 + $0x78] sm:$0xff] %v1390_v48  ;;  %v1199_v32 = vmul.f32 %v2109_v31, %v2844_v17  ;;  %v1200_v0 = vmul.f32 %v2109_v31, %v2846_v14 }
 0x30b   : > { %v1157_v59 = vpop.xlane.xlu0 %1156 }
 0x30c   : > { %1231 = vst [vmem:[%s2948_s25 + $0x80] sm:$0xff] %v1199_v32  ;;  %1232 = vst [vmem:[%s2948_s25 + $0x88] sm:$0xff] %v1200_v0  ;;  %v1391_v10 = vmul.f32 %v2766_v43, %v1199_v32  ;;  %v1392_v62 = vmul.f32 %v2766_v43, %v1200_v0  ;;  %2116 = vrcp.f32 %v1157_v59 }
 0x30d   : > { %v2111_v33 = vpop.eup %2110 }
 0x30e   : > { %1423 = vst [vmem:[%s2955_s23 + $0x80] sm:$0xff] %v1391_v10  ;;  %1424 = vst [vmem:[%s2955_s23 + $0x88] sm:$0xff] %v1392_v62  ;;  %v1201_v13 = vmul.f32 %v2111_v33, %v2852_v42  ;;  %v1202_v17 = vmul.f32 %v2111_v33, %v2854_v34 }
 0x30f   : > { %v1160_v14 = vpop.xlane.xlu1 %1159 }
 0x310   : > { %1233 = vst [vmem:[%s2948_s25 + $0x90] sm:$0xff] %v1201_v13  ;;  %1234 = vst [vmem:[%s2948_s25 + $0x98] sm:$0xff] %v1202_v17  ;;  %v1393_v28 = vmul.f32 %v2764_v38, %v1201_v13  ;;  %v1394_v19 = vmul.f32 %v2764_v38, %v1202_v17  ;;  %2118 = vrcp.f32 %v1160_v14 }
 0x311   : > { %v2113_v43 = vpop.eup %2112 }
 0x312   : > { %1425 = vst [vmem:[%s2955_s23 + $0x90] sm:$0xff] %v1393_v28  ;;  %1426 = vst [vmem:[%s2955_s23 + $0x98] sm:$0xff] %v1394_v19  ;;  %v1203_v15 = vmul.f32 %v2113_v43, %v2860_v1  ;;  %v1204_v42 = vmul.f32 %v2113_v43, %v2862_v58 }
 0x313   : > { %v1163_v34 = vpop.xlane.xlu0 %1162 }
 0x314   : > { %1235 = vst [vmem:[%s2948_s25 + $0xa0] sm:$0xff] %v1203_v15  ;;  %1236 = vst [vmem:[%s2948_s25 + $0xa8] sm:$0xff] %v1204_v42  ;;  %v1395_v45 = vmul.f32 %v2770_v30, %v1203_v15  ;;  %v1396_v18 = vmul.f32 %v2770_v30, %v1204_v42  ;;  %2120 = vrcp.f32 %v1163_v34 }
 0x315   : > { %v2115_v38 = vpop.eup %2114 }
 0x316   : > { %1427 = vst [vmem:[%s2955_s23 + $0xa0] sm:$0xff] %v1395_v45  ;;  %1428 = vst [vmem:[%s2955_s23 + $0xa8] sm:$0xff] %v1396_v18  ;;  %v1205_v1 = vmul.f32 %v2115_v38, %v2868_v23  ;;  %v1206_v7 = vmul.f32 %v2115_v38, %v2870_v29 }
 0x317   : > { %v1166_v58 = vpop.xlane.xlu1 %1165 }
 0x318   : > { %2122 = vrcp.f32 %v1166_v58  ;;  %1237 = vst [vmem:[%s2948_s25 + $0xb0] sm:$0xff] %v1205_v1  ;;  %1238 = vst [vmem:[%s2948_s25 + $0xb8] sm:$0xff] %v1206_v7  ;;  %v1397_v40 = vmul.f32 %v2939_v9, %v1205_v1  ;;  %v1398_v30 = vmul.f32 %v2939_v9, %v1206_v7 }
 0x319   : > { %v2117_v35 = vpop.eup %2116 }
 0x31a   : > { %1429 = vst [vmem:[%s2955_s23 + $0xb0] sm:$0xff] %v1397_v40  ;;  %1430 = vst [vmem:[%s2955_s23 + $0xb8] sm:$0xff] %v1398_v30  ;;  %v1207_v49 = vmul.f32 %v2117_v35, %v2874_v36  ;;  %v1208_v23 = vmul.f32 %v2117_v35, %v2876_v47 }
 0x31c   : > { %1239 = vst [vmem:[%s2948_s25 + $0xc0] sm:$0xff] %v1207_v49  ;;  %1240 = vst [vmem:[%s2948_s25 + $0xc8] sm:$0xff] %v1208_v23  ;;  %v1399_v29 = vmul.f32 %v2943_v22, %v1207_v49  ;;  %v1400_v51 = vmul.f32 %v2943_v22, %v1208_v23 }
 0x31d   : > { %v2119_v21 = vpop.eup %2118 }
 0x31e   : > { %1431 = vst [vmem:[%s2955_s23 + $0xc0] sm:$0xff] %v1399_v29  ;;  %1432 = vst [vmem:[%s2955_s23 + $0xc8] sm:$0xff] %v1400_v51  ;;  %v1209_v9 = vmul.f32 %v2119_v21, %v2880_v39  ;;  %v1210_v36 = vmul.f32 %v2119_v21, %v2882_v37  ;;  %v1368_v39 = vpop.permute.xlu1 %1367 }
 0x320   : > { %1241 = vst [vmem:[%s2948_s25 + $0xd0] sm:$0xff] %v1209_v9  ;;  %1242 = vst [vmem:[%s2948_s25 + $0xd8] sm:$0xff] %v1210_v36  ;;  %v1401_v47 = vmul.f32 %v2941_v46, %v1209_v9  ;;  %v1402_v53 = vmul.f32 %v2941_v46, %v1210_v36 }
 0x321   : > { %v2121_v55 = vpop.eup %2120 }
 0x322   : > { %1433 = vst [vmem:[%s2955_s23 + $0xd0] sm:$0xff] %v1401_v47  ;;  %1434 = vst [vmem:[%s2955_s23 + $0xd8] sm:$0xff] %v1402_v53  ;;  %v1211_v22 = vmul.f32 %v2121_v55, %v2886_v3  ;;  %v1212_v52 = vmul.f32 %v2121_v55, %v2888_v5  ;;  %v1373_v3 = vpop.permute.xlu0 %1372 }
 0x324   : > { %1243 = vst [vmem:[%s2948_s25 + $0xe0] sm:$0xff] %v1211_v22  ;;  %1244 = vst [vmem:[%s2948_s25 + $0xe8] sm:$0xff] %v1212_v52  ;;  %v1403_v54 = vmul.f32 %v1368_v39, %v1211_v22  ;;  %v1404_v46 = vmul.f32 %v1368_v39, %v1212_v52 }
 0x325   : > { %v2123_v37 = vpop.eup %2122 }
 0x326   : > { %v1213_v56 = vmul.f32 %v2123_v37, %v2893_v6  ;;  %v1214_v25 = vmul.f32 %v2123_v37, %v2896_v11  ;;  %1435 = vst [vmem:[%s2955_s23 + $0xe0] sm:$0xff] %v1403_v54  ;;  %1436 = vst [vmem:[%s2955_s23 + $0xe8] sm:$0xff] %v1404_v46 }
 0x328   : > { %1245 = vst [vmem:[%s2948_s25 + $0xf0] sm:$0xff] %v1213_v56  ;;  %1246 = vst [vmem:[%s2948_s25 + $0xf8] sm:$0xff] %v1214_v25  ;;  %v1405_v5 = vmul.f32 %v1373_v3, %v1213_v56  ;;  %v1406_v6 = vmul.f32 %v1373_v3, %v1214_v25  ;;  %s2156_s25 = scalar_lea.vmem %s2155_s0, 8192 }
 0x329   : > { %p2158_p3 = scmp.lt.s32.totalorder %s2156_s25, %s2150_s10 }
 0x32b   : > { %p2159_p4 = por %p2158_p3, %p2157_p2 }
 0x32d   : > { %p2160_p7 = pnand %p2159_p4, %p2153_p1 }
 0x32f   : > { %2163 = shalt.err (!%p2160_p7)
}
 0x330   : > { %s2164_s18 = scalar_lea.hbm %s3075_s17, 4096  ;;  %s2168_s24 = scalar_lea.hbm %s3167_s6, 8192 }
 0x331   : > { %p2165_p8 = scmp.ne.s32.totalorder %s3075_s17, %s2164_s18  ;;  %p2169_p11 = scmp.lt.s32.totalorder %s3075_s17, %s3167_s6 }
 0x332   : > { %p2170_p12 = scmp.lt.s32.totalorder %s2168_s24, %s2164_s18 }
 0x333   : > { %p2166_p9 = pnand %p2165_p8, %p2333_p5 }
 0x334   : > { %p2171_p13 = por %p2170_p12, %p2169_p11 }
 0x335   : > { %p2167_p10 = pneg %p2166_p9 }
 0x337   : > { %p2172_p0 = pnand %p2171_p13, %p2167_p10 }
 0x339   : > { %2175 = shalt.err (!%p2172_p0)
}
 0x33a   : > { %s3183_s0 = smov 16   ;;  %s3184_s10 = smov 256   ;;  %1437 = vst [vmem:[%s2955_s23 + $0xf0] sm:$0xff] %v1405_v5  ;;  %1438 = vst [vmem:[%s2955_s23 + $0xf8] sm:$0xff] %v1406_v6 }
 0x33b   : > { %1829 = dma.vmem_to_hbm [thread:$0]  (%p2333_p5), %s3077_s26, 4096, %s3075_s17, %s1536_s12, %s3184_s10, %s3184_s10, %s3183_s0  }
 0x33c   : > { %s2176_s1 = scalar_lea.vmem %s3089_s19, 4096  ;;  %s2247_s25 = smov [#allocation6]  }
 0x33d   : > { %p2177_p1 = scmp.ne.s32.totalorder %s3089_s19, %s2176_s1  ;;  %s2180_s18 = sshll.u32 %s2247_s25, 4  ;;  %s2181_s18 = int_to_ptr.vmem [resolvable:$false] %s2180_s18 }
 0x33e   : > { %s2182_s21 = scalar_lea.vmem %s2181_s18, 8192  ;;  %p2183_p4 = scmp.lt.s32.totalorder %s3089_s19, %s2181_s18 }
 0x33f   : > { %p2178_p2 = pnand %p2177_p1, %p2333_p5  ;;  %p2184_p7 = scmp.lt.s32.totalorder %s2182_s21, %s2176_s1 }
 0x341   : > { %p2179_p3 = pneg %p2178_p2  ;;  %p2185_p8 = por %p2184_p7, %p2183_p4 }
 0x343   : > { %p2186_p9 = pnand %p2185_p8, %p2179_p3 }
 0x345   : > { %2189 = shalt.err (!%p2186_p9)
}
 0x346   : > { %s2190_s26 = scalar_lea.hbm %s3087_s9, 4096  ;;  %s2194_s12 = scalar_lea.hbm %s3169_s8, 8192 }
 0x347   : > { %p2191_p10 = scmp.ne.s32.totalorder %s3087_s9, %s2190_s26  ;;  %p2195_p13 = scmp.lt.s32.totalorder %s3087_s9, %s3169_s8 }
 0x348   : > { %p2196_p0 = scmp.lt.s32.totalorder %s2194_s12, %s2190_s26 }
 0x349   : > { %p2192_p11 = pnand %p2191_p10, %p2333_p5 }
 0x34a   : > { %p2197_p1 = por %p2196_p0, %p2195_p13 }
 0x34b   : > { %p2193_p12 = pneg %p2192_p11 }
 0x34d   : > { %p2198_p2 = pnand %p2197_p1, %p2193_p12 }
 0x34f   : > { %2201 = shalt.err (!%p2198_p2)
}
 0x350   : > { %1831 = dma.vmem_to_hbm [thread:$0]  (%p2333_p5), %s3089_s19, 4096, %s3087_s9, %s2913_s13, %s3184_s10, %s3184_s10, %s3183_s0  }
 0x351 PF: > { %p1845_p3 = scmp.ge.s32.totalorder %s2240_s30, 2  ;;  %s1609_s20 = sand.u32 1, %s2228_s27  }
 0x352   : > { %s1610_s1 = scalar_lea.sflag [#allocation3], %s1609_s20 }
 0x353   : > { %p1836_p4 = pnand %p1845_p3, %p2337_p6 }
 0x355   : > { %p1837_p7 = pneg %p1836_p4 }
 0x357   : > { %2219 = dma.done.wait (%p1837_p7), %s1610_s1, 4096  }
 0x358   : > { %2221 = vsyncadd (%p1837_p7), %s1610_s1, 4294963200  ;;  %s3185_s15 = sadd.s32 4294967294, %s2240_s30  }
 0x359   : > { %s1618_s25 = sand.u32 1, %s3185_s15  }
 0x35a   : > { %s1619_s18 = scalar_lea.sflag [#allocation5], %s1618_s25 }
 0x35b   : > { %2223 = dma.done.wait (%p1837_p7), %s1619_s18, 8192  }
 0x35c   : > { %2225 = vsyncadd (%p1837_p7), %s1619_s18, 4294959104  ;;  %p22_p5 = scmp.ge.s32.totalorder %s2318_s11, 4   ;;  %s3186_s27 = smov %s2232_s28 }
 0x35d   : > { %s3187_s28 = smov %s2236_s29  ;;  %s3188_s29 = smov %s2331_s14 }
 0x35e   : > { %s3189_s30 = smov %s2318_s11  ;;  %24 = sbr.rel (!%p22_p5) target bundleno = 8 (0x8), region = 114 }
 0x363   :  { %1633 = vsyncpa [#allocation3], 1 }
 0x364   :  { %1635 = vsyncpa [#allocation3 + $0x1], 1 }
 0x365   :  { %1636 = vsyncpa [#allocation5], 1 }
 0x366   :  { %1638 = vsyncpa [#allocation5 + $0x1], 1 }

</bundles_post_ra>
